<compile_context>
chip_gen: v7x
topology: tpu7x:2x2x1
jax: 0.10.0
libtpu: 0.0.40
codegen_flags: <defaults>
</compile_context>

<pallas_src>
import functools

import jax
import jax.numpy as jnp
from jax import lax
from jax.experimental import pallas as pl
from jax.experimental.pallas import tpu as pltpu

EPS = 1e-6   # LayerNorm2d eps


# ----------------------------- kernel helpers --------------------------------

def _ln_normalize(v):
    """LayerNorm over the channel (last) axis, no affine (folded into the next
    1x1 conv).  Two-pass mean/variance in f32; rsqrt runs on the EUP."""
    mu = jnp.mean(v, axis=-1, keepdims=True)
    xc = v - mu
    var = jnp.mean(xc * xc, axis=-1, keepdims=True)
    return xc * lax.rsqrt(var + EPS)


def _dot_bf16(a_f32, w_ref):
    """MXU matmul with bf16 operands and f32 accumulation."""
    return jnp.dot(a_f32.astype(jnp.bfloat16), w_ref[...],
                   preferred_element_type=jnp.float32)


# ------------------------------- pass 1 kernel -------------------------------
# norm1 -> conv1 (1x1) -> conv2 (3x3 depthwise, padding=1) -> SimpleGate
# outputs: gated activation (bf16) + per-tile SCA pool partial (f32)

def _naf_pass1_kernel(x_top_ref, x_ref, x_bot_ref,
                      w1_ref, b1_ref, k2_ref, b2_ref,
                      gate_ref, pool_ref):
    _, TR, W, C = x_ref.shape
    Dp = w1_ref.shape[1]
    half = Dp // 2

    t_idx = pl.program_id(1)
    is_first = t_idx == 0
    is_last = t_idx == pl.num_programs(1) - 1

    # Rows [r0-1, r0+TR+1): 1-row halo above/below (clamped duplicates at the
    # image edges; those rows are masked to zero after conv1 below).
    xs = jnp.concatenate([x_top_ref[0], x_ref[0], x_bot_ref[0]], axis=0)
    xs = xs.astype(jnp.float32)                               # (TR+2, W, C)

    # norm1 (affine folded into w1/b1) + conv1 on all TR+2 rows.
    h = _ln_normalize(xs.reshape((TR + 2) * W, C))
    t = _dot_bf16(h, w1_ref) + b1_ref[...]
    t = t.reshape(TR + 2, W, Dp)

    # conv2 zero-pads its input (= conv1 output) at the image border: kill the
    # halo rows that fall outside the image.
    row_id = lax.broadcasted_iota(jnp.int32, (TR + 2, W, Dp), 0)
    drop = jnp.logical_or(jnp.logical_and(is_first, row_id == 0),
                          jnp.logical_and(is_last, row_id == TR + 1))
    t = jnp.where(drop, 0.0, t)

    # W-shifted planes (left / right neighbour value, zero at the image edge),
    # built once so the 9 taps below are pure (aligned) row-offset reads.
    zcol = jnp.zeros((TR + 2, 1, Dp), jnp.float32)
    t_lft = jnp.concatenate([zcol, t[:, :W - 1, :]], axis=1)   # value at col w-1
    t_rgt = jnp.concatenate([t[:, 1:, :], zcol], axis=1)       # value at col w+1

    # 3x3 depthwise conv: accumulator seeded with centre tap + bias.
    k2 = k2_ref[...]                                           # (9, Dp)
    acc = t[1:1 + TR] * k2[4] + b2_ref[...]
    for i in range(3):
        for j, plane in enumerate((t_lft, t, t_rgt)):
            if i == 1 and j == 1:
                continue
            acc = acc + plane[i:i + TR] * k2[i * 3 + j]

    # SimpleGate.
    gate = acc[:, :, :half] * acc[:, :, half:]                 # (TR, W, half)

    # Per-tile partial sum for the SCA global average pool (kept in f32).
    pool_ref[...] = jnp.sum(gate.reshape(TR * W, half), axis=0).reshape(1, 1, 1, half)
    gate_ref[0] = gate.astype(gate_ref.dtype)


# ------------------------------- pass 2 kernel -------------------------------
# x * sca -> conv3 (beta folded) + residual -> norm2 -> conv4 -> SimpleGate ->
# conv5 (gamma folded) + residual

def _naf_pass2_kernel(x_ref, gate_ref, sca_ref,
                      w3_ref, b3_ref, w4_ref, b4_ref, w5_ref, b5_ref,
                      out_ref):
    _, TR, W, C = x_ref.shape
    half = gate_ref.shape[3]
    Dp = w4_ref.shape[1]
    M = TR * W

    x = x_ref[0].reshape(M, C).astype(jnp.float32)
    g = gate_ref[0].reshape(M, half).astype(jnp.float32) * sca_ref[0]

    # conv3 (beta folded into w3/b3) + residual.
    y = x + _dot_bf16(g, w3_ref) + b3_ref[...]

    # norm2 (affine folded) + conv4 + SimpleGate + conv5 (gamma folded) + residual.
    t = _ln_normalize(y)
    t = _dot_bf16(t, w4_ref) + b4_ref[...]
    t = t[:, :Dp // 2] * t[:, Dp // 2:]
    out = y + _dot_bf16(t, w5_ref) + b5_ref[...]

    out_ref[0] = out.reshape(TR, W, C).astype(out_ref.dtype)


# ------------------------------- host wrappers --------------------------------

def _vmem_capacity_bytes():
    try:
        info = pltpu.get_tpu_info()
        cap = getattr(info, "vmem_capacity_bytes", None)
        if cap:
            return int(cap)
    except Exception:
        pass
    return 64 * 1024 * 1024  # conservative default (v7x per-TC VMEM)


def _choose_tile_rows(H, W, C, Dp, half, vmem_cap):
    """Largest divisor of H whose pass-1 working set fits comfortably in VMEM
    (double-buffered I/O blocks + shifted planes + accumulator), but keep at
    least 2 tiles so the spatial parallel axis can feed both v7x cores."""
    per_row = 4 * W * (3 * C + 6 * Dp + 3 * half) + 1
    target = max(1, (vmem_cap // 3) // per_row)
    target = min(target, max(H // 2, 1))
    tr = 1
    for d in range(1, H + 1):
        if H % d == 0 and d <= target:
            tr = d
    return tr


def prepare_naf_params(params):
    """Fold LayerNorm affines / beta / gamma into the adjacent 1x1 convs and
    pre-cast the matmul weights to bf16.  Run once per parameter set."""
    (n1w, n1b, w1, b1, k2, b2, wsca, bsca, w3, b3, beta,
     n2w, n2b, w4, b4, w5, b5, gamma) = params
    bf16 = jnp.bfloat16
    f32 = jnp.float32
    return dict(
        w1=(n1w.reshape(-1, 1) * w1).astype(bf16),
        b1=(n1b @ w1 + b1).astype(f32),
        k2=k2.astype(f32),
        b2=b2.astype(f32),
        wsca=wsca.astype(f32),
        bsca=bsca.astype(f32),
        w3=(w3 * beta).astype(bf16),
        b3=(b3 * beta).astype(f32),
        w4=(n2w.reshape(-1, 1) * w4).astype(bf16),
        b4=(n2b @ w4 + b4).astype(f32),
        w5=(w5 * gamma).astype(bf16),
        b5=(b5 * gamma).astype(f32),
    )


def naf_block(x, prep):
    """NAFBlock forward. x: (N, H, W, dim) NHWC float32; prep from prepare_naf_params."""
    N, H, W, C = x.shape
    dim, Dp = prep["w1"].shape
    half = Dp // 2
    out_dim = prep["w5"].shape[1]
    assert C == dim, "input channels must equal dim"
    assert out_dim == dim, "final residual requires out_dim == dim"

    vmem_cap = _vmem_capacity_bytes()
    vmem_limit = max(32 * 1024 * 1024, min(int(vmem_cap * 3 // 4), 96 * 1024 * 1024))
    TR = _choose_tile_rows(H, W, C, Dp, half, vmem_cap)
    T = H // TR
    M = H * W

    cparams = pltpu.CompilerParams(
        dimension_semantics=("parallel", "parallel"),
        vmem_limit_bytes=vmem_limit,
    )

    def const_spec(a):
        nd = a.ndim
        return pl.BlockSpec(a.shape, lambda n, t, _nd=nd: (0,) * _nd)

    # ---- pass 1: norm1 -> conv1 -> dwconv3x3 -> SimpleGate (+ pool partials)
    p1_weights = (prep["w1"], prep["b1"], prep["k2"], prep["b2"])
    gate, pool_part = pl.pallas_call(
        _naf_pass1_kernel,
        grid=(N, T),
        in_specs=[
            # 1-row halo above (clamped at the top image edge, masked in-kernel)
            pl.BlockSpec((1, 1, W, C),
                         lambda n, t: (n, jnp.maximum(t * TR - 1, 0), 0, 0)),
            # main row strip
            pl.BlockSpec((1, TR, W, C), lambda n, t: (n, t, 0, 0)),
            # 1-row halo below (clamped at the bottom image edge, masked in-kernel)
            pl.BlockSpec((1, 1, W, C),
                         lambda n, t: (n, jnp.minimum((t + 1) * TR, H - 1), 0, 0)),
        ] + [const_spec(w) for w in p1_weights],
        out_specs=[
            pl.BlockSpec((1, TR, W, half), lambda n, t: (n, t, 0, 0)),
            pl.BlockSpec((1, 1, 1, half), lambda n, t: (n, t, 0, 0)),
        ],
        out_shape=[
            jax.ShapeDtypeStruct((N, H, W, half), jnp.bfloat16),
            jax.ShapeDtypeStruct((N, T, 1, half), jnp.float32),
        ],
        compiler_params=cparams,
        cost_estimate=pl.CostEstimate(
            flops=N * M * (2 * C * Dp + 18 * Dp + half),
            transcendentals=N * M,
            bytes_accessed=4 * N * M * C + 2 * N * M * half + 4 * N * T * half),
    )(x, x, x, *p1_weights)

    # ---- SCA (tiny, per image): global average pool + 1x1 conv, in plain JAX
    pool = jnp.sum(pool_part, axis=(1, 2)) / float(M)            # (N, half)
    sca = (pool @ prep["wsca"] + prep["bsca"]).reshape(N, 1, half)

    # ---- pass 2: scale + conv3 + residual, norm2 -> conv4 -> SG -> conv5 + residual
    p2_weights = (prep["w3"], prep["b3"], prep["w4"], prep["b4"],
                  prep["w5"], prep["b5"])
    out = pl.pallas_call(
        _naf_pass2_kernel,
        grid=(N, T),
        in_specs=[
            pl.BlockSpec((1, TR, W, C), lambda n, t: (n, t, 0, 0)),
            pl.BlockSpec((1, TR, W, half), lambda n, t: (n, t, 0, 0)),
            pl.BlockSpec((1, 1, half), lambda n, t: (n, 0, 0)),
        ] + [const_spec(w) for w in p2_weights],
        out_specs=pl.BlockSpec((1, TR, W, C), lambda n, t: (n, t, 0, 0)),
        out_shape=jax.ShapeDtypeStruct((N, H, W, C), x.dtype),
        compiler_params=cparams,
        cost_estimate=pl.CostEstimate(
            flops=N * M * (4 * half * C + 2 * C * Dp + half),
            transcendentals=N * M,
            bytes_accessed=8 * N * M * C + 2 * N * M * half),
    )(x, gate, sca, *p2_weights)
    return out


# ------------------------------ pure-JAX reference ----------------------------

def naf_block_ref(x, params):
    (n1w, n1b, w1, b1, k2, b2, wsca, bsca, w3, b3, beta,
     n2w, n2b, w4, b4, w5, b5, gamma) = params
    N, H, W, C = x.shape

    def ln(v, w_, b_):
        mu = jnp.mean(v, axis=-1, keepdims=True)
        var = jnp.mean((v - mu) ** 2, axis=-1, keepdims=True)
        return (v - mu) / jnp.sqrt(var + EPS) * w_.reshape(-1) + b_.reshape(-1)

    inp = x
    h = ln(inp, n1w, n1b)
    h = jnp.einsum('nhwc,cd->nhwd', h, w1) + b1.reshape(-1)
    hp = jnp.pad(h, ((0, 0), (1, 1), (1, 1), (0, 0)))
    acc = jnp.zeros_like(h)
    for i in range(3):
        for j in range(3):
            acc = acc + hp[:, i:i + H, j:j + W, :] * k2[i * 3 + j]
    h = acc + b2.reshape(-1)
    half = h.shape[-1] // 2
    h = h[..., :half] * h[..., half:]
    pool = jnp.mean(h, axis=(1, 2), keepdims=True)
    sca = jnp.einsum('nijc,cd->nijd', pool, wsca) + bsca.reshape(-1)
    h = h * sca
    h = jnp.einsum('nhwc,cd->nhwd', h, w3) + b3.reshape(-1)
    y = inp + h * beta.reshape(-1)
    h = ln(y, n2w, n2b)
    h = jnp.einsum('nhwc,cd->nhwd', h, w4) + b4.reshape(-1)
    fh = h.shape[-1] // 2
    h = h[..., :fh] * h[..., fh:]
    h = jnp.einsum('nhwc,cd->nhwd', h, w5) + b5.reshape(-1)
    return y + h * gamma.reshape(-1)


def make_params(dim, expand_dim, out_dim, layer_scale_init_value=1e-6):
    keys = jax.random.split(jax.random.PRNGKey(0), 12)
    nrm = lambda k, s: (0.1 * jax.random.normal(k, s)).astype(jnp.float32)
    half = expand_dim // 2
    n1w = jnp.ones((1, dim), jnp.float32)
    n1b = jnp.zeros((1, dim), jnp.float32)
    w1 = nrm(keys[0], (dim, expand_dim))
    b1 = nrm(keys[1], (1, expand_dim))
    k2 = nrm(keys[2], (9, expand_dim))          # depthwise 3x3 taps (row i*3+j)
    b2 = nrm(keys[3], (1, expand_dim))
    wsca = nrm(keys[4], (half, half))
    bsca = nrm(keys[5], (1, half))
    w3 = nrm(keys[6], (half, dim))
    b3 = nrm(keys[7], (1, dim))
    beta = jnp.full((1, dim), layer_scale_init_value, jnp.float32)
    n2w = jnp.ones((1, dim), jnp.float32)
    n2b = jnp.zeros((1, dim), jnp.float32)
    w4 = nrm(keys[8], (dim, expand_dim))
    b4 = nrm(keys[9], (1, expand_dim))
    w5 = nrm(keys[10], (half, out_dim))
    b5 = nrm(keys[11], (1, out_dim))
    gamma = jnp.full((1, out_dim), layer_scale_init_value, jnp.float32)
    return (n1w, n1b, w1, b1, k2, b2, wsca, bsca, w3, b3, beta,
            n2w, n2b, w4, b4, w5, b5, gamma)


if __name__ == "__main__":
    N, dim, H, W = 2, 4, 16, 16
    expand_dim, out_dim = 8, 4   # out_dim == dim (required for final residual)

    # layer_scale 1.0 so both branches materially contribute to the output
    # (the default 1e-6 would make the accuracy check trivially pass).
    params = make_params(dim, expand_dim, out_dim, layer_scale_init_value=1.0)
    x = jax.random.normal(jax.random.PRNGKey(0), (N, H, W, dim), jnp.float32)

    prep = prepare_naf_params(params)          # one-time fold/cast, hoisted out
    fwd = jax.jit(naf_block)
    out = jax.block_until_ready(fwd(x, prep))

    ref = naf_block_ref(x, params)
    max_err = float(jnp.max(jnp.abs(out - ref)))
    assert max_err < 5e-2, f"mismatch vs reference: {max_err}"
    print("KERNEL_OK")
</pallas_src>

<mosaic_0001>
module attributes {stable_mosaic.version = 11 : i64} {
  func.func @_naf_pass1_kernel(%arg0: i32, %arg1: i32, %arg2: memref<1x1x16x4xf32, #tpu.memory_space<vmem>>, %arg3: memref<1x8x16x4xf32, #tpu.memory_space<vmem>>, %arg4: memref<1x1x16x4xf32, #tpu.memory_space<vmem>>, %arg5: memref<4x8xbf16, #tpu.memory_space<vmem>>, %arg6: memref<1x8xf32, #tpu.memory_space<vmem>>, %arg7: memref<9x8xf32, #tpu.memory_space<vmem>>, %arg8: memref<1x8xf32, #tpu.memory_space<vmem>>, %arg9: memref<1x8x16x4xbf16, #tpu.memory_space<vmem>>, %arg10: memref<1x1x1x4xf32, #tpu.memory_space<vmem>>) attributes {dimension_semantics = [#tpu.dimension_semantics<parallel>, #tpu.dimension_semantics<parallel>], iteration_bounds = array<i64: 2, 2>, scalar_prefetch = 0 : i64, scratch_operands = 0 : i64, tpu.core_type = #tpu.core_type<tc>, window_params = [{transform_indices = @transform_0, window_bounds = array<i64: 1, 1, 16, 4>}, {transform_indices = @transform_1, window_bounds = array<i64: 1, 8, 16, 4>}, {transform_indices = @transform_2, window_bounds = array<i64: 1, 1, 16, 4>}, {pipeline_mode = #tpu.pipeline_mode<synchronous>, transform_indices = @transform_3, window_bounds = array<i64: 4, 8>}, {pipeline_mode = #tpu.pipeline_mode<synchronous>, transform_indices = @transform_4, window_bounds = array<i64: 1, 8>}, {pipeline_mode = #tpu.pipeline_mode<synchronous>, transform_indices = @transform_5, window_bounds = array<i64: 9, 8>}, {pipeline_mode = #tpu.pipeline_mode<synchronous>, transform_indices = @transform_6, window_bounds = array<i64: 1, 8>}, {transform_indices = @transform_7, window_bounds = array<i64: 1, 8, 16, 4>}, {transform_indices = @transform_8, window_bounds = array<i64: 1, 1, 1, 4>}]} {
    %c0_i32 = arith.constant 0 : i32
    %0 = arith.cmpi eq, %arg1, %c0_i32 : i32
    %c1_i32 = arith.constant 1 : i32
    %1 = arith.cmpi eq, %arg1, %c1_i32 : i32
    %c0 = arith.constant 0 : index
    %c0_0 = arith.constant 0 : index
    %c0_1 = arith.constant 0 : index
    %c0_2 = arith.constant 0 : index
    %2 = vector.load %arg2[%c0, %c0_0, %c0_1, %c0_2] : memref<1x1x16x4xf32, #tpu.memory_space<vmem>>, vector<1x1x16x4xf32>
    %3 = vector.shape_cast %2 : vector<1x1x16x4xf32> to vector<1x16x4xf32>
    %c0_3 = arith.constant 0 : index
    %c0_4 = arith.constant 0 : index
    %c0_5 = arith.constant 0 : index
    %c0_6 = arith.constant 0 : index
    %4 = vector.load %arg3[%c0_3, %c0_4, %c0_5, %c0_6] : memref<1x8x16x4xf32, #tpu.memory_space<vmem>>, vector<1x8x16x4xf32>
    %5 = vector.shape_cast %4 : vector<1x8x16x4xf32> to vector<8x16x4xf32>
    %c0_7 = arith.constant 0 : index
    %c0_8 = arith.constant 0 : index
    %c0_9 = arith.constant 0 : index
    %c0_10 = arith.constant 0 : index
    %6 = vector.load %arg4[%c0_7, %c0_8, %c0_9, %c0_10] : memref<1x1x16x4xf32, #tpu.memory_space<vmem>>, vector<1x1x16x4xf32>
    %7 = vector.shape_cast %6 : vector<1x1x16x4xf32> to vector<1x16x4xf32>
    %8 = tpu.concatenate %3, %5, %7 in 0 : vector<1x16x4xf32>, vector<8x16x4xf32>, vector<1x16x4xf32> -> vector<10x16x4xf32>
    %9 = vector.shape_cast %8 : vector<10x16x4xf32> to vector<160x4xf32>
    %cst = arith.constant dense<0.000000e+00> : vector<160xf32>
    %10 = vector.multi_reduction <add>, %9, %cst [1] : vector<160x4xf32> to vector<160xf32>
    %11 = vector.shape_cast %10 : vector<160xf32> to vector<160x1xf32>
    %cst_11 = arith.constant 4.000000e+00 : f32
    %12 = vector.broadcast %cst_11 : f32 to vector<160x1xf32>
    %13 = arith.divf %11, %12 : vector<160x1xf32>
    %14 = vector.broadcast %13 : vector<160x1xf32> to vector<160x4xf32>
    %15 = arith.subf %9, %14 : vector<160x4xf32>
    %16 = arith.mulf %15, %15 : vector<160x4xf32>
    %cst_12 = arith.constant dense<0.000000e+00> : vector<160xf32>
    %17 = vector.multi_reduction <add>, %16, %cst_12 [1] : vector<160x4xf32> to vector<160xf32>
    %18 = vector.shape_cast %17 : vector<160xf32> to vector<160x1xf32>
    %cst_13 = arith.constant 4.000000e+00 : f32
    %19 = vector.broadcast %cst_13 : f32 to vector<160x1xf32>
    %20 = arith.divf %18, %19 : vector<160x1xf32>
    %cst_14 = arith.constant 9.99999997E-7 : f32
    %21 = vector.broadcast %cst_14 : f32 to vector<160x1xf32>
    %22 = arith.addf %20, %21 : vector<160x1xf32>
    %23 = math.rsqrt %22 : vector<160x1xf32>
    %24 = vector.broadcast %23 : vector<160x1xf32> to vector<160x4xf32>
    %25 = arith.mulf %15, %24 : vector<160x4xf32>
    %26 = arith.truncf %25 : vector<160x4xf32> to vector<160x4xbf16>
    %c0_15 = arith.constant 0 : index
    %c0_16 = arith.constant 0 : index
    %27 = vector.load %arg5[%c0_15, %c0_16] : memref<4x8xbf16, #tpu.memory_space<vmem>>, vector<4x8xbf16>
    %cst_17 = arith.constant dense<0.000000e+00> : vector<160x8xf32>
    %28 = tpu.matmul %26, %27, %cst_17 {dimension_numbers = #tpu.dot_dimension_numbers<[1], [0], [0], [1], [0, 0, 1, 1], [], []>} : vector<160x4xbf16>, vector<4x8xbf16>, vector<160x8xf32> -> vector<160x8xf32>
    %c0_18 = arith.constant 0 : index
    %c0_19 = arith.constant 0 : index
    %29 = vector.load %arg6[%c0_18, %c0_19] : memref<1x8xf32, #tpu.memory_space<vmem>>, vector<1x8xf32>
    %30 = vector.broadcast %29 : vector<1x8xf32> to vector<160x8xf32>
    %31 = arith.addf %28, %30 : vector<160x8xf32>
    %32 = vector.shape_cast %31 : vector<160x8xf32> to vector<10x16x8xf32>
    %33 = tpu.iota {dimensions = array<i32: 0>} : vector<10x16x8xi32>
    %c0_i32_20 = arith.constant 0 : i32
    %34 = vector.broadcast %c0_i32_20 : i32 to vector<10x16x8xi32>
    %35 = arith.cmpi eq, %33, %34 : vector<10x16x8xi32>
    %36 = vector.broadcast %0 : i1 to vector<10x16x8xi1>
    %37 = arith.andi %36, %35 : vector<10x16x8xi1>
    %c9_i32 = arith.constant 9 : i32
    %38 = vector.broadcast %c9_i32 : i32 to vector<10x16x8xi32>
    %39 = arith.cmpi eq, %33, %38 : vector<10x16x8xi32>
    %40 = vector.broadcast %1 : i1 to vector<10x16x8xi1>
    %41 = arith.andi %40, %39 : vector<10x16x8xi1>
    %42 = arith.ori %37, %41 : vector<10x16x8xi1>
    %cst_21 = arith.constant 0.000000e+00 : f32
    %43 = vector.broadcast %cst_21 : f32 to vector<10x16x8xf32>
    %44 = arith.select %42, %43, %32 : vector<10x16x8xi1>, vector<10x16x8xf32>
    %cst_22 = arith.constant 0.000000e+00 : f32
    %45 = vector.broadcast %cst_22 : f32 to vector<10x1x8xf32>
    %46 = vector.extract_strided_slice %44 {offsets = [0, 0, 0], sizes = [10, 15, 8], strides = [1, 1, 1]} : vector<10x16x8xf32> to vector<10x15x8xf32>
    %47 = tpu.concatenate %45, %46 in 1 : vector<10x1x8xf32>, vector<10x15x8xf32> -> vector<10x16x8xf32>
    %48 = vector.extract_strided_slice %44 {offsets = [0, 1, 0], sizes = [10, 15, 8], strides = [1, 1, 1]} : vector<10x16x8xf32> to vector<10x15x8xf32>
    %49 = tpu.concatenate %48, %45 in 1 : vector<10x15x8xf32>, vector<10x1x8xf32> -> vector<10x16x8xf32>
    %c0_23 = arith.constant 0 : index
    %c0_24 = arith.constant 0 : index
    %50 = vector.load %arg7[%c0_23, %c0_24] : memref<9x8xf32, #tpu.memory_space<vmem>>, vector<9x8xf32>
    %51 = vector.extract_strided_slice %44 {offsets = [1, 0, 0], sizes = [8, 16, 8], strides = [1, 1, 1]} : vector<10x16x8xf32> to vector<8x16x8xf32>
    %52 = vector.extract_strided_slice %50 {offsets = [4, 0], sizes = [1, 8], strides = [1, 1]} : vector<9x8xf32> to vector<1x8xf32>
    %53 = vector.shape_cast %52 : vector<1x8xf32> to vector<8xf32>
    %54 = vector.shape_cast %53 : vector<8xf32> to vector<1x1x8xf32>
    %55 = vector.broadcast %54 : vector<1x1x8xf32> to vector<8x16x8xf32>
    %56 = arith.mulf %51, %55 : vector<8x16x8xf32>
    %c0_25 = arith.constant 0 : index
    %c0_26 = arith.constant 0 : index
    %57 = vector.load %arg8[%c0_25, %c0_26] : memref<1x8xf32, #tpu.memory_space<vmem>>, vector<1x8xf32>
    %58 = vector.shape_cast %57 : vector<1x8xf32> to vector<1x1x8xf32>
    %59 = vector.broadcast %58 : vector<1x1x8xf32> to vector<8x16x8xf32>
    %60 = arith.addf %56, %59 : vector<8x16x8xf32>
    %61 = vector.extract_strided_slice %47 {offsets = [0, 0, 0], sizes = [8, 16, 8], strides = [1, 1, 1]} : vector<10x16x8xf32> to vector<8x16x8xf32>
    %62 = vector.extract_strided_slice %50 {offsets = [0, 0], sizes = [1, 8], strides = [1, 1]} : vector<9x8xf32> to vector<1x8xf32>
    %63 = vector.shape_cast %62 : vector<1x8xf32> to vector<8xf32>
    %64 = vector.shape_cast %63 : vector<8xf32> to vector<1x1x8xf32>
    %65 = vector.broadcast %64 : vector<1x1x8xf32> to vector<8x16x8xf32>
    %66 = arith.mulf %61, %65 : vector<8x16x8xf32>
    %67 = arith.addf %60, %66 : vector<8x16x8xf32>
    %68 = vector.extract_strided_slice %44 {offsets = [0, 0, 0], sizes = [8, 16, 8], strides = [1, 1, 1]} : vector<10x16x8xf32> to vector<8x16x8xf32>
    %69 = vector.extract_strided_slice %50 {offsets = [1, 0], sizes = [1, 8], strides = [1, 1]} : vector<9x8xf32> to vector<1x8xf32>
    %70 = vector.shape_cast %69 : vector<1x8xf32> to vector<8xf32>
    %71 = vector.shape_cast %70 : vector<8xf32> to vector<1x1x8xf32>
    %72 = vector.broadcast %71 : vector<1x1x8xf32> to vector<8x16x8xf32>
    %73 = arith.mulf %68, %72 : vector<8x16x8xf32>
    %74 = arith.addf %67, %73 : vector<8x16x8xf32>
    %75 = vector.extract_strided_slice %49 {offsets = [0, 0, 0], sizes = [8, 16, 8], strides = [1, 1, 1]} : vector<10x16x8xf32> to vector<8x16x8xf32>
    %76 = vector.extract_strided_slice %50 {offsets = [2, 0], sizes = [1, 8], strides = [1, 1]} : vector<9x8xf32> to vector<1x8xf32>
    %77 = vector.shape_cast %76 : vector<1x8xf32> to vector<8xf32>
    %78 = vector.shape_cast %77 : vector<8xf32> to vector<1x1x8xf32>
    %79 = vector.broadcast %78 : vector<1x1x8xf32> to vector<8x16x8xf32>
    %80 = arith.mulf %75, %79 : vector<8x16x8xf32>
    %81 = arith.addf %74, %80 : vector<8x16x8xf32>
    %82 = vector.extract_strided_slice %47 {offsets = [1, 0, 0], sizes = [8, 16, 8], strides = [1, 1, 1]} : vector<10x16x8xf32> to vector<8x16x8xf32>
    %83 = vector.extract_strided_slice %50 {offsets = [3, 0], sizes = [1, 8], strides = [1, 1]} : vector<9x8xf32> to vector<1x8xf32>
    %84 = vector.shape_cast %83 : vector<1x8xf32> to vector<8xf32>
    %85 = vector.shape_cast %84 : vector<8xf32> to vector<1x1x8xf32>
    %86 = vector.broadcast %85 : vector<1x1x8xf32> to vector<8x16x8xf32>
    %87 = arith.mulf %82, %86 : vector<8x16x8xf32>
    %88 = arith.addf %81, %87 : vector<8x16x8xf32>
    %89 = vector.extract_strided_slice %49 {offsets = [1, 0, 0], sizes = [8, 16, 8], strides = [1, 1, 1]} : vector<10x16x8xf32> to vector<8x16x8xf32>
    %90 = vector.extract_strided_slice %50 {offsets = [5, 0], sizes = [1, 8], strides = [1, 1]} : vector<9x8xf32> to vector<1x8xf32>
    %91 = vector.shape_cast %90 : vector<1x8xf32> to vector<8xf32>
    %92 = vector.shape_cast %91 : vector<8xf32> to vector<1x1x8xf32>
    %93 = vector.broadcast %92 : vector<1x1x8xf32> to vector<8x16x8xf32>
    %94 = arith.mulf %89, %93 : vector<8x16x8xf32>
    %95 = arith.addf %88, %94 : vector<8x16x8xf32>
    %96 = vector.extract_strided_slice %47 {offsets = [2, 0, 0], sizes = [8, 16, 8], strides = [1, 1, 1]} : vector<10x16x8xf32> to vector<8x16x8xf32>
    %97 = vector.extract_strided_slice %50 {offsets = [6, 0], sizes = [1, 8], strides = [1, 1]} : vector<9x8xf32> to vector<1x8xf32>
    %98 = vector.shape_cast %97 : vector<1x8xf32> to vector<8xf32>
    %99 = vector.shape_cast %98 : vector<8xf32> to vector<1x1x8xf32>
    %100 = vector.broadcast %99 : vector<1x1x8xf32> to vector<8x16x8xf32>
    %101 = arith.mulf %96, %100 : vector<8x16x8xf32>
    %102 = arith.addf %95, %101 : vector<8x16x8xf32>
    %103 = vector.extract_strided_slice %44 {offsets = [2, 0, 0], sizes = [8, 16, 8], strides = [1, 1, 1]} : vector<10x16x8xf32> to vector<8x16x8xf32>
    %104 = vector.extract_strided_slice %50 {offsets = [7, 0], sizes = [1, 8], strides = [1, 1]} : vector<9x8xf32> to vector<1x8xf32>
    %105 = vector.shape_cast %104 : vector<1x8xf32> to vector<8xf32>
    %106 = vector.shape_cast %105 : vector<8xf32> to vector<1x1x8xf32>
    %107 = vector.broadcast %106 : vector<1x1x8xf32> to vector<8x16x8xf32>
    %108 = arith.mulf %103, %107 : vector<8x16x8xf32>
    %109 = arith.addf %102, %108 : vector<8x16x8xf32>
    %110 = vector.extract_strided_slice %49 {offsets = [2, 0, 0], sizes = [8, 16, 8], strides = [1, 1, 1]} : vector<10x16x8xf32> to vector<8x16x8xf32>
    %111 = vector.extract_strided_slice %50 {offsets = [8, 0], sizes = [1, 8], strides = [1, 1]} : vector<9x8xf32> to vector<1x8xf32>
    %112 = vector.shape_cast %111 : vector<1x8xf32> to vector<8xf32>
    %113 = vector.shape_cast %112 : vector<8xf32> to vector<1x1x8xf32>
    %114 = vector.broadcast %113 : vector<1x1x8xf32> to vector<8x16x8xf32>
    %115 = arith.mulf %110, %114 : vector<8x16x8xf32>
    %116 = arith.addf %109, %115 : vector<8x16x8xf32>
    %117 = vector.extract_strided_slice %116 {offsets = [0, 0, 0], sizes = [8, 16, 4], strides = [1, 1, 1]} : vector<8x16x8xf32> to vector<8x16x4xf32>
    %118 = vector.extract_strided_slice %116 {offsets = [0, 0, 4], sizes = [8, 16, 4], strides = [1, 1, 1]} : vector<8x16x8xf32> to vector<8x16x4xf32>
    %119 = arith.mulf %117, %118 : vector<8x16x4xf32>
    %120 = vector.shape_cast %119 : vector<8x16x4xf32> to vector<128x4xf32>
    %cst_27 = arith.constant dense<0.000000e+00> : vector<4xf32>
    %121 = vector.multi_reduction <add>, %120, %cst_27 [0] : vector<128x4xf32> to vector<4xf32>
    %122 = vector.shape_cast %121 : vector<4xf32> to vector<1x1x1x4xf32>
    %c0_28 = arith.constant 0 : index
    %c0_29 = arith.constant 0 : index
    %c0_30 = arith.constant 0 : index
    %c0_31 = arith.constant 0 : index
    %123 = vector.load %arg10[%c0_28, %c0_29, %c0_30, %c0_31] : memref<1x1x1x4xf32, #tpu.memory_space<vmem>>, vector<1x1x1x4xf32>
    tpu.vector_store %arg10[%c0_28, %c0_29, %c0_30, %c0_31], %122 {strides = array<i32>} : memref<1x1x1x4xf32, #tpu.memory_space<vmem>>, vector<1x1x1x4xf32>,
    %124 = arith.truncf %119 : vector<8x16x4xf32> to vector<8x16x4xbf16>
    %c0_32 = arith.constant 0 : index
    %c0_33 = arith.constant 0 : index
    %c0_34 = arith.constant 0 : index
    %c0_35 = arith.constant 0 : index
    %125 = vector.load %arg9[%c0_32, %c0_33, %c0_34, %c0_35] : memref<1x8x16x4xbf16, #tpu.memory_space<vmem>>, vector<1x8x16x4xbf16>
    %126 = vector.shape_cast %125 : vector<1x8x16x4xbf16> to vector<8x16x4xbf16>
    %127 = vector.shape_cast %124 : vector<8x16x4xbf16> to vector<1x8x16x4xbf16>
    tpu.vector_store %arg9[%c0_32, %c0_33, %c0_34, %c0_35], %127 {strides = array<i32>} : memref<1x8x16x4xbf16, #tpu.memory_space<vmem>>, vector<1x8x16x4xbf16>,
    return
  }
  func.func @transform_0(%arg0: i32, %arg1: i32) -> (i32, i32, i32, i32) {
    %c8_i32 = arith.constant 8 : i32
    %0 = arith.muli %arg1, %c8_i32 : i32
    %c1_i32 = arith.constant 1 : i32
    %1 = arith.subi %0, %c1_i32 : i32
    %c0_i32 = arith.constant 0 : i32
    %2 = arith.maxsi %1, %c0_i32 : i32
    %c0_i32_0 = arith.constant 0 : i32
    %c0_i32_1 = arith.constant 0 : i32
    %c0_i32_2 = arith.constant 0 : i32
    return %arg0, %2, %c0_i32_0, %c0_i32_1 : i32, i32, i32, i32
  }
  func.func @transform_1(%arg0: i32, %arg1: i32) -> (i32, i32, i32, i32) {
    %c0_i32 = arith.constant 0 : i32
    %c0_i32_0 = arith.constant 0 : i32
    %c0_i32_1 = arith.constant 0 : i32
    return %arg0, %arg1, %c0_i32, %c0_i32_0 : i32, i32, i32, i32
  }
  func.func @transform_2(%arg0: i32, %arg1: i32) -> (i32, i32, i32, i32) {
    %c1_i32 = arith.constant 1 : i32
    %0 = arith.addi %arg1, %c1_i32 : i32
    %c8_i32 = arith.constant 8 : i32
    %1 = arith.muli %0, %c8_i32 : i32
    %c15_i32 = arith.constant 15 : i32
    %2 = arith.minsi %1, %c15_i32 : i32
    %c0_i32 = arith.constant 0 : i32
    %c0_i32_0 = arith.constant 0 : i32
    %c0_i32_1 = arith.constant 0 : i32
    return %arg0, %2, %c0_i32, %c0_i32_0 : i32, i32, i32, i32
  }
  func.func @transform_3(%arg0: i32, %arg1: i32) -> (i32, i32) {
    %c0_i32 = arith.constant 0 : i32
    %c0_i32_0 = arith.constant 0 : i32
    %c0_i32_1 = arith.constant 0 : i32
    return %c0_i32, %c0_i32_0 : i32, i32
  }
  func.func @transform_4(%arg0: i32, %arg1: i32) -> (i32, i32) {
    %c0_i32 = arith.constant 0 : i32
    %c0_i32_0 = arith.constant 0 : i32
    %c0_i32_1 = arith.constant 0 : i32
    return %c0_i32, %c0_i32_0 : i32, i32
  }
  func.func @transform_5(%arg0: i32, %arg1: i32) -> (i32, i32) {
    %c0_i32 = arith.constant 0 : i32
    %c0_i32_0 = arith.constant 0 : i32
    %c0_i32_1 = arith.constant 0 : i32
    return %c0_i32, %c0_i32_0 : i32, i32
  }
  func.func @transform_6(%arg0: i32, %arg1: i32) -> (i32, i32) {
    %c0_i32 = arith.constant 0 : i32
    %c0_i32_0 = arith.constant 0 : i32
    %c0_i32_1 = arith.constant 0 : i32
    return %c0_i32, %c0_i32_0 : i32, i32
  }
  func.func @transform_7(%arg0: i32, %arg1: i32) -> (i32, i32, i32, i32) {
    %c0_i32 = arith.constant 0 : i32
    %c0_i32_0 = arith.constant 0 : i32
    %c0_i32_1 = arith.constant 0 : i32
    return %arg0, %arg1, %c0_i32, %c0_i32_0 : i32, i32, i32, i32
  }
  func.func @transform_8(%arg0: i32, %arg1: i32) -> (i32, i32, i32, i32) {
    %c0_i32 = arith.constant 0 : i32
    %c0_i32_0 = arith.constant 0 : i32
    %c0_i32_1 = arith.constant 0 : i32
    return %arg0, %arg1, %c0_i32, %c0_i32_0 : i32, i32, i32, i32
  }
}

module attributes {stable_mosaic.version = 11 : i64} {
  func.func @_naf_pass2_kernel(%arg0: i32, %arg1: i32, %arg2: memref<1x8x16x4xf32, #tpu.memory_space<vmem>>, %arg3: memref<1x8x16x4xbf16, #tpu.memory_space<vmem>>, %arg4: memref<1x1x4xf32, #tpu.memory_space<vmem>>, %arg5: memref<4x4xbf16, #tpu.memory_space<vmem>>, %arg6: memref<1x4xf32, #tpu.memory_space<vmem>>, %arg7: memref<4x8xbf16, #tpu.memory_space<vmem>>, %arg8: memref<1x8xf32, #tpu.memory_space<vmem>>, %arg9: memref<4x4xbf16, #tpu.memory_space<vmem>>, %arg10: memref<1x4xf32, #tpu.memory_space<vmem>>, %arg11: memref<1x8x16x4xf32, #tpu.memory_space<vmem>>) attributes {dimension_semantics = [#tpu.dimension_semantics<parallel>, #tpu.dimension_semantics<parallel>], iteration_bounds = array<i64: 2, 2>, scalar_prefetch = 0 : i64, scratch_operands = 0 : i64, tpu.core_type = #tpu.core_type<tc>, window_params = [{transform_indices = @transform_0, window_bounds = array<i64: 1, 8, 16, 4>}, {transform_indices = @transform_1, window_bounds = array<i64: 1, 8, 16, 4>}, {transform_indices = @transform_2, window_bounds = array<i64: 1, 1, 4>}, {pipeline_mode = #tpu.pipeline_mode<synchronous>, transform_indices = @transform_3, window_bounds = array<i64: 4, 4>}, {pipeline_mode = #tpu.pipeline_mode<synchronous>, transform_indices = @transform_4, window_bounds = array<i64: 1, 4>}, {pipeline_mode = #tpu.pipeline_mode<synchronous>, transform_indices = @transform_5, window_bounds = array<i64: 4, 8>}, {pipeline_mode = #tpu.pipeline_mode<synchronous>, transform_indices = @transform_6, window_bounds = array<i64: 1, 8>}, {pipeline_mode = #tpu.pipeline_mode<synchronous>, transform_indices = @transform_7, window_bounds = array<i64: 4, 4>}, {pipeline_mode = #tpu.pipeline_mode<synchronous>, transform_indices = @transform_8, window_bounds = array<i64: 1, 4>}, {transform_indices = @transform_9, window_bounds = array<i64: 1, 8, 16, 4>}]} {
    %c0 = arith.constant 0 : index
    %c0_0 = arith.constant 0 : index
    %c0_1 = arith.constant 0 : index
    %c0_2 = arith.constant 0 : index
    %0 = vector.load %arg2[%c0, %c0_0, %c0_1, %c0_2] : memref<1x8x16x4xf32, #tpu.memory_space<vmem>>, vector<1x8x16x4xf32>
    %1 = vector.shape_cast %0 : vector<1x8x16x4xf32> to vector<8x16x4xf32>
    %2 = vector.shape_cast %1 : vector<8x16x4xf32> to vector<128x4xf32>
    %c0_3 = arith.constant 0 : index
    %c0_4 = arith.constant 0 : index
    %c0_5 = arith.constant 0 : index
    %c0_6 = arith.constant 0 : index
    %3 = vector.load %arg3[%c0_3, %c0_4, %c0_5, %c0_6] : memref<1x8x16x4xbf16, #tpu.memory_space<vmem>>, vector<1x8x16x4xbf16>
    %4 = vector.shape_cast %3 : vector<1x8x16x4xbf16> to vector<8x16x4xbf16>
    %5 = vector.shape_cast %4 : vector<8x16x4xbf16> to vector<128x4xbf16>
    %6 = arith.extf %5 : vector<128x4xbf16> to vector<128x4xf32>
    %c0_7 = arith.constant 0 : index
    %c0_8 = arith.constant 0 : index
    %c0_9 = arith.constant 0 : index
    %7 = vector.load %arg4[%c0_7, %c0_8, %c0_9] : memref<1x1x4xf32, #tpu.memory_space<vmem>>, vector<1x1x4xf32>
    %8 = vector.shape_cast %7 : vector<1x1x4xf32> to vector<1x4xf32>
    %9 = vector.broadcast %8 : vector<1x4xf32> to vector<128x4xf32>
    %10 = arith.mulf %6, %9 : vector<128x4xf32>
    %11 = arith.truncf %10 : vector<128x4xf32> to vector<128x4xbf16>
    %c0_10 = arith.constant 0 : index
    %c0_11 = arith.constant 0 : index
    %12 = vector.load %arg5[%c0_10, %c0_11] : memref<4x4xbf16, #tpu.memory_space<vmem>>, vector<4x4xbf16>
    %cst = arith.constant dense<0.000000e+00> : vector<128x4xf32>
    %13 = tpu.matmul %11, %12, %cst {dimension_numbers = #tpu.dot_dimension_numbers<[1], [0], [0], [1], [0, 0, 1, 1], [], []>} : vector<128x4xbf16>, vector<4x4xbf16>, vector<128x4xf32> -> vector<128x4xf32>
    %14 = arith.addf %2, %13 : vector<128x4xf32>
    %c0_12 = arith.constant 0 : index
    %c0_13 = arith.constant 0 : index
    %15 = vector.load %arg6[%c0_12, %c0_13] : memref<1x4xf32, #tpu.memory_space<vmem>>, vector<1x4xf32>
    %16 = vector.broadcast %15 : vector<1x4xf32> to vector<128x4xf32>
    %17 = arith.addf %14, %16 : vector<128x4xf32>
    %cst_14 = arith.constant dense<0.000000e+00> : vector<128xf32>
    %18 = vector.multi_reduction <add>, %17, %cst_14 [1] : vector<128x4xf32> to vector<128xf32>
    %19 = vector.shape_cast %18 : vector<128xf32> to vector<128x1xf32>
    %cst_15 = arith.constant 4.000000e+00 : f32
    %20 = vector.broadcast %cst_15 : f32 to vector<128x1xf32>
    %21 = arith.divf %19, %20 : vector<128x1xf32>
    %22 = vector.broadcast %21 : vector<128x1xf32> to vector<128x4xf32>
    %23 = arith.subf %17, %22 : vector<128x4xf32>
    %24 = arith.mulf %23, %23 : vector<128x4xf32>
    %cst_16 = arith.constant dense<0.000000e+00> : vector<128xf32>
    %25 = vector.multi_reduction <add>, %24, %cst_16 [1] : vector<128x4xf32> to vector<128xf32>
    %26 = vector.shape_cast %25 : vector<128xf32> to vector<128x1xf32>
    %cst_17 = arith.constant 4.000000e+00 : f32
    %27 = vector.broadcast %cst_17 : f32 to vector<128x1xf32>
    %28 = arith.divf %26, %27 : vector<128x1xf32>
    %cst_18 = arith.constant 9.99999997E-7 : f32
    %29 = vector.broadcast %cst_18 : f32 to vector<128x1xf32>
    %30 = arith.addf %28, %29 : vector<128x1xf32>
    %31 = math.rsqrt %30 : vector<128x1xf32>
    %32 = vector.broadcast %31 : vector<128x1xf32> to vector<128x4xf32>
    %33 = arith.mulf %23, %32 : vector<128x4xf32>
    %34 = arith.truncf %33 : vector<128x4xf32> to vector<128x4xbf16>
    %c0_19 = arith.constant 0 : index
    %c0_20 = arith.constant 0 : index
    %35 = vector.load %arg7[%c0_19, %c0_20] : memref<4x8xbf16, #tpu.memory_space<vmem>>, vector<4x8xbf16>
    %cst_21 = arith.constant dense<0.000000e+00> : vector<128x8xf32>
    %36 = tpu.matmul %34, %35, %cst_21 {dimension_numbers = #tpu.dot_dimension_numbers<[1], [0], [0], [1], [0, 0, 1, 1], [], []>} : vector<128x4xbf16>, vector<4x8xbf16>, vector<128x8xf32> -> vector<128x8xf32>
    %c0_22 = arith.constant 0 : index
    %c0_23 = arith.constant 0 : index
    %37 = vector.load %arg8[%c0_22, %c0_23] : memref<1x8xf32, #tpu.memory_space<vmem>>, vector<1x8xf32>
    %38 = vector.broadcast %37 : vector<1x8xf32> to vector<128x8xf32>
    %39 = arith.addf %36, %38 : vector<128x8xf32>
    %40 = vector.extract_strided_slice %39 {offsets = [0, 0], sizes = [128, 4], strides = [1, 1]} : vector<128x8xf32> to vector<128x4xf32>
    %41 = vector.extract_strided_slice %39 {offsets = [0, 4], sizes = [128, 4], strides = [1, 1]} : vector<128x8xf32> to vector<128x4xf32>
    %42 = arith.mulf %40, %41 : vector<128x4xf32>
    %43 = arith.truncf %42 : vector<128x4xf32> to vector<128x4xbf16>
    %c0_24 = arith.constant 0 : index
    %c0_25 = arith.constant 0 : index
    %44 = vector.load %arg9[%c0_24, %c0_25] : memref<4x4xbf16, #tpu.memory_space<vmem>>, vector<4x4xbf16>
    %cst_26 = arith.constant dense<0.000000e+00> : vector<128x4xf32>
    %45 = tpu.matmul %43, %44, %cst_26 {dimension_numbers = #tpu.dot_dimension_numbers<[1], [0], [0], [1], [0, 0, 1, 1], [], []>} : vector<128x4xbf16>, vector<4x4xbf16>, vector<128x4xf32> -> vector<128x4xf32>
    %46 = arith.addf %17, %45 : vector<128x4xf32>
    %c0_27 = arith.constant 0 : index
    %c0_28 = arith.constant 0 : index
    %47 = vector.load %arg10[%c0_27, %c0_28] : memref<1x4xf32, #tpu.memory_space<vmem>>, vector<1x4xf32>
    %48 = vector.broadcast %47 : vector<1x4xf32> to vector<128x4xf32>
    %49 = arith.addf %46, %48 : vector<128x4xf32>
    %50 = vector.shape_cast %49 : vector<128x4xf32> to vector<8x16x4xf32>
    %c0_29 = arith.constant 0 : index
    %c0_30 = arith.constant 0 : index
    %c0_31 = arith.constant 0 : index
    %c0_32 = arith.constant 0 : index
    %51 = vector.load %arg11[%c0_29, %c0_30, %c0_31, %c0_32] : memref<1x8x16x4xf32, #tpu.memory_space<vmem>>, vector<1x8x16x4xf32>
    %52 = vector.shape_cast %51 : vector<1x8x16x4xf32> to vector<8x16x4xf32>
    %53 = vector.shape_cast %50 : vector<8x16x4xf32> to vector<1x8x16x4xf32>
    tpu.vector_store %arg11[%c0_29, %c0_30, %c0_31, %c0_32], %53 {strides = array<i32>} : memref<1x8x16x4xf32, #tpu.memory_space<vmem>>, vector<1x8x16x4xf32>,
    return
  }
  func.func @transform_0(%arg0: i32, %arg1: i32) -> (i32, i32, i32, i32) {
    %c0_i32 = arith.constant 0 : i32
    %c0_i32_0 = arith.constant 0 : i32
    %c0_i32_1 = arith.constant 0 : i32
    return %arg0, %arg1, %c0_i32, %c0_i32_0 : i32, i32, i32, i32
  }
  func.func @transform_1(%arg0: i32, %arg1: i32) -> (i32, i32, i32, i32) {
    %c0_i32 = arith.constant 0 : i32
    %c0_i32_0 = arith.constant 0 : i32
    %c0_i32_1 = arith.constant 0 : i32
    return %arg0, %arg1, %c0_i32, %c0_i32_0 : i32, i32, i32, i32
  }
  func.func @transform_2(%arg0: i32, %arg1: i32) -> (i32, i32, i32) {
    %c0_i32 = arith.constant 0 : i32
    %c0_i32_0 = arith.constant 0 : i32
    %c0_i32_1 = arith.constant 0 : i32
    return %arg0, %c0_i32, %c0_i32_0 : i32, i32, i32
  }
  func.func @transform_3(%arg0: i32, %arg1: i32) -> (i32, i32) {
    %c0_i32 = arith.constant 0 : i32
    %c0_i32_0 = arith.constant 0 : i32
    %c0_i32_1 = arith.constant 0 : i32
    return %c0_i32, %c0_i32_0 : i32, i32
  }
  func.func @transform_4(%arg0: i32, %arg1: i32) -> (i32, i32) {
    %c0_i32 = arith.constant 0 : i32
    %c0_i32_0 = arith.constant 0 : i32
    %c0_i32_1 = arith.constant 0 : i32
    return %c0_i32, %c0_i32_0 : i32, i32
  }
  func.func @transform_5(%arg0: i32, %arg1: i32) -> (i32, i32) {
    %c0_i32 = arith.constant 0 : i32
    %c0_i32_0 = arith.constant 0 : i32
    %c0_i32_1 = arith.constant 0 : i32
    return %c0_i32, %c0_i32_0 : i32, i32
  }
  func.func @transform_6(%arg0: i32, %arg1: i32) -> (i32, i32) {
    %c0_i32 = arith.constant 0 : i32
    %c0_i32_0 = arith.constant 0 : i32
    %c0_i32_1 = arith.constant 0 : i32
    return %c0_i32, %c0_i32_0 : i32, i32
  }
  func.func @transform_7(%arg0: i32, %arg1: i32) -> (i32, i32) {
    %c0_i32 = arith.constant 0 : i32
    %c0_i32_0 = arith.constant 0 : i32
    %c0_i32_1 = arith.constant 0 : i32
    return %c0_i32, %c0_i32_0 : i32, i32
  }
  func.func @transform_8(%arg0: i32, %arg1: i32) -> (i32, i32) {
    %c0_i32 = arith.constant 0 : i32
    %c0_i32_0 = arith.constant 0 : i32
    %c0_i32_1 = arith.constant 0 : i32
    return %c0_i32, %c0_i32_0 : i32, i32
  }
  func.func @transform_9(%arg0: i32, %arg1: i32) -> (i32, i32, i32, i32) {
    %c0_i32 = arith.constant 0 : i32
    %c0_i32_0 = arith.constant 0 : i32
    %c0_i32_1 = arith.constant 0 : i32
    return %arg0, %arg1, %c0_i32, %c0_i32_0 : i32, i32, i32, i32
  }
}

</mosaic_0001>

<bundles_post_ra>
// kernel: naf_block.2
= control target key start
LH: loop header
LB: loop body
LE: loop exit
PB: predicated region body
PF: predicated region fallthrough
CT: control target
= control target key end

     0   :  { %s2122_s27 = smov 0   ;;  %s2124_s28 = smov 0   ;;  %s3184_s0 = inlined_call_operand.vmem [shape: f32[2,16,16,4], index: 0, kind: input, shape index: {}, may-alias: {0,1,2}]   ;;  %s3185_s1 = inlined_call_operand.vmem [shape: f32[2,16,16,4], index: 1, kind: input, shape index: {}, may-alias: {0,1,2}]   ;;  %s3186_s2 = inlined_call_operand.vmem [shape: f32[2,16,16,4], index: 2, kind: input, shape index: {}, may-alias: {0,1,2}]   ;;  %s3187_s3 = inlined_call_operand.vmem [shape: bf16[4,8], index: 3, kind: input, shape index: {}]   ;;  %s3188_s4 = inlined_call_operand.vmem [shape: f32[1,8], index: 4, kind: input, shape index: {}]   ;;  %s3189_s5 = inlined_call_operand.vmem [shape: f32[9,8], index: 5, kind: input, shape index: {}]   ;;  %s3190_s6 = inlined_call_operand.vmem [shape: f32[1,8], index: 6, kind: input, shape index: {}]   ;;  %s3191_s7 = inlined_call_operand.vmem [shape: bf16[2,16,16,4], index: 7, kind: output, shape index: {0}]   ;;  %s3192_s8 = inlined_call_operand.vmem [shape: f32[2,2,1,4], index: 8, kind: output, shape index: {1}]  }
   0x1   :  { %s2126_s29 = smov 0   ;;  %s2128_s30 = smov 0  }
   0x2   :  { %s2130_s9 = smov 0  }
   0x3 LB: > { %s28_s10 = sadd.s32 1, %s2066_s29  ;;  %s31_s11 = sadd.s32 1, %s2070_s30  ;;  %s2074_s9 = sphi %s2130_s9, %s19_s9   ;;  %s2070_s30 = sphi %s2128_s30, %s3245_s30   ;;  %s2066_s29 = sphi %s2126_s29, %s3244_s29   ;;  %s2062_s28 = sphi %s2124_s28, %s3243_s28   ;;  %s2058_s27 = sphi %s2122_s27, %s3242_s27  }
   0x4   : > { %p29_p0 = scmp.ge.s32.totalorder %s28_s10, 2  ;;  %p1836_p1 = scmp.ge.s32.totalorder %s2074_s9, 1 }
   0x5   : > { %p353_p2 = scmp.lt.s32.totalorder %s2074_s9, 5 }
   0x6   : > { %s3247_s10 = smov (%p29_p0, %s28_s10), 0  ;;  %s3249_s11 = smov (!%p29_p0, %s31_s11), %s2070_s30 }
   0x7   : > { %p354_p3 = pnand %p1836_p1, %p353_p2  ;;  %p33_p4 = scmp.ge.s32.totalorder %s3249_s11, 2 }
   0x9   : > { %s3251_s11 = smov (%p33_p4, %s3249_s11), 0  ;;  %357 = sbr.rel (%p354_p3) target bundleno = 801 (0x321), region = 48 }
   0xa   : > { %3196 = sst [smem:[#allocation2_spill]] %s3251_s11 }
  0x10   : > { %s2155_s12 = sshll.u32 %s2058_s27, 3  ;;  %p434_p5 = scmp.lt.s32.totalorder %s2062_s28, 1  ;;  %vm516_vm0 = vcmask 31744   ;;  %vm826_vm1 = vcmask 1041408   ;;  %vm989_vm3 = vcmask 1040384   ;;  %vm1050_vm4 = vcmask 1046528  }
  0x11   : > { %s1838_s13 = sadd.s32 4294967295, %s2155_s12  ;;  %p450_p6 = scmp.lt.s32.totalorder %s2155_s12, 15  ;;  %vm1627_vm6 = vcmask 27648   ;;  %vm1561_vm7 = vcmask 24576  }
  0x12   : > { %p432_p7 = scmp.gt.s32.totalorder %s1838_s13, 0  ;;  %p1839_p8 = scmp.lt.s32.totalorder %s1838_s13, 15 }
  0x13   : > { %s3253_s28 = smov (!%p434_p5, %s2062_s28), 1  ;;  %p494_p10 = scmp.eq.s32.totalorder %s2058_s27, 0 }
  0x14   : > { %s3255_s13 = smov (!%p432_p7, %s1838_s13), 0  ;;  %s2162_s14 = sshll.u32 %s3253_s28, 5 }
  0x15   : > { %s3257_s13 = smov (!%p1839_p8, %s3255_s13), 15  ;;  %p495_p11 = scmp.eq.s32.totalorder %s2058_s27, 1 }
  0x16   : > { %s451_s15 = scalar_select %p450_p6, %s2155_s12, 15 }
  0x17   : > { %s1844_s16 = sshll.u32 %s3257_s13, 1  ;;  %s1901_s13 = sadd.s32 8, %s2155_s12 }
  0x18   : > { %s440_s17 = sadd.s32 %s2162_s14, %s1844_s16  ;;  %s1848_s18 = sshll.u32 %s451_s15, 1 }
  0x19   : > { %s1846_s19 = sshll.u32 %s440_s17, 3  ;;  %s2167_s20 = sadd.s32 %s1848_s18, %s2162_s14 }
  0x1a   : > { %s442_s23 = scalar_lea.vmem %s3184_s0, %s1846_s19  ;;  %s1850_s24 = sshll.u32 %s2167_s20, 3 }
  0x1b   : > { %s2176_s11 = scalar_lea.vmem %s3185_s1, %s1850_s24  ;;  %v2178_v0 = vld [vmem:[%s442_s23] sm:$0xff]  ;;  %v2180_v1 = vld [vmem:[%s442_s23 + $0x8] sm:$0xff]  ;;  %p2210_p9 = scmp.lt.s32.totalorder %s1901_s13, 15 }
  0x1c   : > { %v517_v2 = vsel %vm516_vm0, %v2178_v0, 0.0  ;;  %v2185_v3 = vld [vmem:[%s2176_s11] sm:$0xff]  ;;  %v2188_v4 = vld [vmem:[%s2176_s11 + $0x8] sm:$0xff]  ;;  %v520_v6 = vsel %vm516_vm0, %v2180_v1, 0.0  ;;  %v2197_v8 = vld [vmem:[%s2176_s11 + $0x10] sm:$0xff]  ;;  %s1861_s18 = sshll.u32 %s2167_s20, 2 }
  0x1d   : > { %518 = vadd.xlane.f32.xlu0 %v517_v2  ;;  %v523_v5 = vsel %vm516_vm0, %v2185_v3, 0.0  ;;  %v526_v7 = vsel %vm516_vm0, %v2188_v4, 0.0  ;;  %v2200_v9 = vld [vmem:[%s2176_s11 + $0x18] sm:$0xff]  ;;  %v529_v10 = vsel %vm516_vm0, %v2197_v8, 0.0  ;;  %v2208_v12 = vld [vmem:[%s2176_s11 + $0x20] sm:$0xff]  ;;  %v2215_v13 = vld [vmem:[%s2176_s11 + $0x28] sm:$0xff]  ;;  %s3098_s21 = scalar_lea.vmem %s3191_s7, %s1861_s18 }
  0x1e   : > { %524 = vadd.xlane.f32.xlu1 %v523_v5  ;;  %v532_v11 = vsel %vm516_vm0, %v2200_v9, 0.0  ;;  %v535_v14 = vsel %vm516_vm0, %v2208_v12, 0.0  ;;  %v538_v15 = vsel %vm516_vm0, %v2215_v13, 0.0  ;;  %v2222_v16 = vld [vmem:[%s2176_s11 + $0x30] sm:$0xff]  ;;  %s3259_s13 = smov (!%p2210_p9, %s1901_s13), 15  ;;  %v2227_v17 = vld [vmem:[%s2176_s11 + $0x38] sm:$0xff] }
  0x1f   : > { %v541_v18 = vsel %vm516_vm0, %v2222_v16, 0.0  ;;  %v544_v19 = vsel %vm516_vm0, %v2227_v17, 0.0  ;;  %v2234_v20 = vld [vmem:[%s2176_s11 + $0x40] sm:$0xff]  ;;  %s3261_s13 = smov (!%p2210_p9, %s3259_s13), 15  ;;  %v2239_v21 = vld [vmem:[%s2176_s11 + $0x48] sm:$0xff]  ;;  %v2246_v24 = vld [vmem:[%s2176_s11 + $0x50] sm:$0xff] }
  0x20   : > { %v547_v22 = vsel %vm516_vm0, %v2234_v20, 0.0  ;;  %v550_v23 = vsel %vm516_vm0, %v2239_v21, 0.0  ;;  %s1855_s12 = sshll.u32 %s3261_s13, 1  ;;  %v2249_v25 = vld [vmem:[%s2176_s11 + $0x58] sm:$0xff]  ;;  %v553_v26 = vsel %vm516_vm0, %v2246_v24, 0.0  ;;  %v2257_v28 = vld [vmem:[%s2176_s11 + $0x60] sm:$0xff] }
  0x21   : > { %521 = vadd.xlane.f32.xlu0 %v520_v6  ;;  %s468_s16 = sadd.s32 %s1855_s12, %s2162_s14  ;;  %v556_v27 = vsel %vm516_vm0, %v2249_v25, 0.0  ;;  %v2260_v29 = vld [vmem:[%s2176_s11 + $0x68] sm:$0xff]  ;;  %v559_v30 = vsel %vm516_vm0, %v2257_v28, 0.0  ;;  %v2267_v32 = vld [vmem:[%s2176_s11 + $0x70] sm:$0xff]  ;;  %v2270_v33 = vld [vmem:[%s2176_s11 + $0x78] sm:$0xff]  ;;  %s2076_s14 = smov 124  }
  0x22   : > { %527 = vadd.xlane.f32.xlu1 %v526_v7  ;;  %s1857_s17 = sshll.u32 %s468_s16, 3  ;;  %v562_v31 = vsel %vm516_vm0, %v2260_v29, 0.0  ;;  %v565_v34 = vsel %vm516_vm0, %v2267_v32, 0.0  ;;  %v568_v35 = vsel %vm516_vm0, %v2270_v33, 0.0  ;;  %p488_p12 = scmp.lt.s32.totalorder %s2058_s27, 1 }
  0x23   : > { %s470_s19 = scalar_lea.vmem %s3186_s2, %s1857_s17  ;;  %s1862_s20 = sshll.u32 %s3253_s28, 1 }
  0x24   : > { %v2279_v36 = vld [vmem:[%s470_s19] sm:$0xff]  ;;  %v2281_v37 = vld [vmem:[%s470_s19 + $0x8] sm:$0xff]  ;;  %s943_s22 = scalar_select %p494_p10, 1, 0 }
  0x25   : > { %530 = vadd.xlane.f32.xlu0 %v529_v10  ;;  %v571_v38 = vsel %vm516_vm0, %v2279_v36, 0.0  ;;  %v574_v39 = vsel %vm516_vm0, %v2281_v37, 0.0  ;;  %s2467_s13 = scalar_select %p495_p11, 1, 0 }
  0x26   : > { %533 = vadd.xlane.f32.xlu1 %v532_v11  ;;  %s3263_s27 = smov (!%p488_p12, %s2058_s27), 1 }
  0x29   : > { %536 = vadd.xlane.f32.xlu0 %v535_v14 }
  0x2a   : > { %539 = vadd.xlane.f32.xlu1 %v538_v15 }
  0x2d   : > { %542 = vadd.xlane.f32.xlu0 %v541_v18 }
  0x2e   : > { %545 = vadd.xlane.f32.xlu1 %v544_v19 }
  0x31   : > { %548 = vadd.xlane.f32.xlu0 %v547_v22 }
  0x32   : > { %551 = vadd.xlane.f32.xlu1 %v550_v23 }
  0x35   : > { %554 = vadd.xlane.f32.xlu0 %v553_v26 }
  0x36   : > { %557 = vadd.xlane.f32.xlu1 %v556_v27 }
  0x39   : > { %560 = vadd.xlane.f32.xlu0 %v559_v30 }
  0x3a   : > { %563 = vadd.xlane.f32.xlu1 %v562_v31 }
  0x3d   : > { %566 = vadd.xlane.f32.xlu0 %v565_v34 }
  0x3e   : > { %569 = vadd.xlane.f32.xlu1 %v568_v35 }
  0x41   : > { %572 = vadd.xlane.f32.xlu0 %v571_v38 }
  0x42   : > { %575 = vadd.xlane.f32.xlu1 %v574_v39 }
  0xaa   : > { %v519_v40 = vpop.xlane.xlu0 %518 }
  0xab   : > { %v578_v41 = vmul.f32 0.25, %v519_v40  ;;  %v525_v42 = vpop.xlane.xlu1 %524 }
  0xac   : > { %v580_v43 = vmul.f32 0.25, %v525_v42 }
  0xad   : > { %v2288_v44 = vsub.f32 %v2178_v0, %v578_v41 }
  0xae   : > { %v2291_v45 = vsub.f32 %v2185_v3, %v580_v43  ;;  %v522_v46 = vpop.xlane.xlu0 %521 }
  0xaf   : > { %v579_v47 = vmul.f32 0.25, %v522_v46  ;;  %v528_v48 = vpop.xlane.xlu1 %527  ;;  %v618_v49 = vmul.f32 %v2288_v44, %v2288_v44 }
  0xb0   : > { %v581_v50 = vmul.f32 0.25, %v528_v48  ;;  %v620_v51 = vmul.f32 %v2291_v45, %v2291_v45 }
  0xb1   : > { %v2298_v52 = vsub.f32 %v2180_v1, %v579_v47  ;;  %v638_v53 = vsel %vm516_vm0, %v618_v49, 0.0 }
  0xb2   : > { %v2302_v54 = vsub.f32 %v2188_v4, %v581_v50  ;;  %639 = vadd.xlane.f32.xlu0 %v638_v53  ;;  %v531_v55 = vpop.xlane.xlu0 %530  ;;  %v644_v58 = vsel %vm516_vm0, %v620_v51, 0.0 }
  0xb3   : > { %v582_v56 = vmul.f32 0.25, %v531_v55  ;;  %v534_v57 = vpop.xlane.xlu1 %533  ;;  %v619_v59 = vmul.f32 %v2298_v52, %v2298_v52 }
  0xb4   : > { %v583_v60 = vmul.f32 0.25, %v534_v57  ;;  %v621_v61 = vmul.f32 %v2302_v54, %v2302_v54 }
  0xb5   : > { %v2310_v62 = vsub.f32 %v2197_v8, %v582_v56  ;;  %v641_v63 = vsel %vm516_vm0, %v619_v59, 0.0 }
  0xb6   : > { %v2314_v0 = vsub.f32 %v2200_v9, %v583_v60  ;;  %645 = vadd.xlane.f32.xlu0 %v644_v58  ;;  %642 = vadd.xlane.f32.xlu1 %v641_v63  ;;  %v537_v1 = vpop.xlane.xlu0 %536  ;;  %v647_v4 = vsel %vm516_vm0, %v621_v61, 0.0 }
  0xb7   : > { %v584_v2 = vmul.f32 0.25, %v537_v1  ;;  %v540_v3 = vpop.xlane.xlu1 %539  ;;  %v622_v5 = vmul.f32 %v2310_v62, %v2310_v62 }
  0xb8   : > { %v585_v6 = vmul.f32 0.25, %v540_v3  ;;  %v623_v7 = vmul.f32 %v2314_v0, %v2314_v0 }
  0xb9   : > { %v2322_v8 = vsub.f32 %v2208_v12, %v584_v2  ;;  %v650_v9 = vsel %vm516_vm0, %v622_v5, 0.0 }
  0xba   : > { %v2326_v10 = vsub.f32 %v2215_v13, %v585_v6  ;;  %648 = vadd.xlane.f32.xlu1 %v647_v4  ;;  %651 = vadd.xlane.f32.xlu0 %v650_v9  ;;  %v543_v11 = vpop.xlane.xlu0 %542  ;;  %v653_v18 = vsel %vm516_vm0, %v623_v7, 0.0 }
  0xbb   : > { %v586_v14 = vmul.f32 0.25, %v543_v11  ;;  %v546_v15 = vpop.xlane.xlu1 %545  ;;  %v624_v19 = vmul.f32 %v2322_v8, %v2322_v8 }
  0xbc   : > { %v587_v22 = vmul.f32 0.25, %v546_v15  ;;  %v625_v12 = vmul.f32 %v2326_v10, %v2326_v10 }
  0xbd   : > { %v2334_v23 = vsub.f32 %v2222_v16, %v586_v14  ;;  %v656_v13 = vsel %vm516_vm0, %v624_v19, 0.0 }
  0xbe   : > { %v2338_v26 = vsub.f32 %v2227_v17, %v587_v22  ;;  %654 = vadd.xlane.f32.xlu1 %v653_v18  ;;  %657 = vadd.xlane.f32.xlu0 %v656_v13  ;;  %v549_v27 = vpop.xlane.xlu0 %548  ;;  %v659_v34 = vsel %vm516_vm0, %v625_v12, 0.0 }
  0xbf   : > { %v588_v30 = vmul.f32 0.25, %v549_v27  ;;  %v552_v31 = vpop.xlane.xlu1 %551  ;;  %v626_v35 = vmul.f32 %v2334_v23, %v2334_v23 }
  0xc0   : > { %v589_v38 = vmul.f32 0.25, %v552_v31  ;;  %v627_v16 = vmul.f32 %v2338_v26, %v2338_v26 }
  0xc1   : > { %v2346_v39 = vsub.f32 %v2234_v20, %v588_v30  ;;  %v662_v17 = vsel %vm516_vm0, %v626_v35, 0.0 }
  0xc2   : > { %v2350_v40 = vsub.f32 %v2239_v21, %v589_v38  ;;  %660 = vadd.xlane.f32.xlu1 %v659_v34  ;;  %663 = vadd.xlane.f32.xlu0 %v662_v17  ;;  %v555_v41 = vpop.xlane.xlu0 %554  ;;  %v665_v46 = vsel %vm516_vm0, %v627_v16, 0.0 }
  0xc3   : > { %v590_v42 = vmul.f32 0.25, %v555_v41  ;;  %v558_v43 = vpop.xlane.xlu1 %557  ;;  %v628_v47 = vmul.f32 %v2346_v39, %v2346_v39 }
  0xc4   : > { %v591_v48 = vmul.f32 0.25, %v558_v43  ;;  %v629_v20 = vmul.f32 %v2350_v40, %v2350_v40 }
  0xc5   : > { %v2358_v49 = vsub.f32 %v2246_v24, %v590_v42  ;;  %v668_v21 = vsel %vm516_vm0, %v628_v47, 0.0 }
  0xc6   : > { %v2362_v50 = vsub.f32 %v2249_v25, %v591_v48  ;;  %666 = vadd.xlane.f32.xlu1 %v665_v46  ;;  %669 = vadd.xlane.f32.xlu0 %v668_v21  ;;  %v561_v51 = vpop.xlane.xlu0 %560  ;;  %v671_v56 = vsel %vm516_vm0, %v629_v20, 0.0 }
  0xc7   : > { %v592_v53 = vmul.f32 0.25, %v561_v51  ;;  %v564_v55 = vpop.xlane.xlu1 %563  ;;  %v630_v57 = vmul.f32 %v2358_v49, %v2358_v49 }
  0xc8   : > { %v593_v58 = vmul.f32 0.25, %v564_v55  ;;  %v631_v24 = vmul.f32 %v2362_v50, %v2362_v50 }
  0xc9   : > { %v2370_v59 = vsub.f32 %v2257_v28, %v592_v53  ;;  %v674_v25 = vsel %vm516_vm0, %v630_v57, 0.0 }
  0xca   : > { %v2374_v60 = vsub.f32 %v2260_v29, %v593_v58  ;;  %672 = vadd.xlane.f32.xlu1 %v671_v56  ;;  %675 = vadd.xlane.f32.xlu0 %v674_v25  ;;  %v567_v61 = vpop.xlane.xlu0 %566  ;;  %v677_v2 = vsel %vm516_vm0, %v631_v24, 0.0 }
  0xcb   : > { %v594_v63 = vmul.f32 0.25, %v567_v61  ;;  %v570_v1 = vpop.xlane.xlu1 %569  ;;  %v632_v3 = vmul.f32 %v2370_v59, %v2370_v59 }
  0xcc   : > { %v595_v4 = vmul.f32 0.25, %v570_v1  ;;  %v633_v28 = vmul.f32 %v2374_v60, %v2374_v60 }
  0xcd   : > { %v2382_v5 = vsub.f32 %v2267_v32, %v594_v63  ;;  %v680_v29 = vsel %vm516_vm0, %v632_v3, 0.0 }
  0xce   : > { %v2386_v6 = vsub.f32 %v2270_v33, %v595_v4  ;;  %678 = vadd.xlane.f32.xlu1 %v677_v2  ;;  %681 = vadd.xlane.f32.xlu0 %v680_v29  ;;  %v573_v7 = vpop.xlane.xlu0 %572  ;;  %v683_v14 = vsel %vm516_vm0, %v633_v28, 0.0 }
  0xcf   : > { %v596_v9 = vmul.f32 0.25, %v573_v7  ;;  %v576_v11 = vpop.xlane.xlu1 %575  ;;  %v634_v15 = vmul.f32 %v2382_v5, %v2382_v5 }
  0xd0   : > { %v597_v18 = vmul.f32 0.25, %v576_v11  ;;  %v635_v32 = vmul.f32 %v2386_v6, %v2386_v6 }
  0xd1   : > { %v2394_v19 = vsub.f32 %v2279_v36, %v596_v9  ;;  %v686_v33 = vsel %vm516_vm0, %v634_v15, 0.0 }
  0xd2   : > { %v2398_v22 = vsub.f32 %v2281_v37, %v597_v18  ;;  %684 = vadd.xlane.f32.xlu1 %v683_v14  ;;  %687 = vadd.xlane.f32.xlu0 %v686_v33  ;;  %v689_v12 = vsel %vm516_vm0, %v635_v32, 0.0  ;;  %v788_v37 = vld [vmem:[%s3187_s3] sm:$0x3] }
  0xd3   : > { %v636_v13 = vmul.f32 %v2394_v19, %v2394_v19  ;;  %1953 = vmatprep.subr.msk.bf16.mxu0 %vm826_vm1, %v788_v37  ;;  %v828_v31 = vsel %vm826_vm1, %v788_v37, 0  ;;  %1954 = vmatprep.subr.msk.bf16.mxu1 %vm826_vm1, %v788_v37 }
  0xd4   : > { %v637_v27 = vmul.f32 %v2398_v22, %v2398_v22  ;;  %1930 = vmatpush3.bf16.msra.mxu0 %v828_v31  ;;  %1952 = vmatpush3.bf16.msra.mxu1 %v828_v31 }
  0xd5   : > { %v692_v30 = vsel %vm516_vm0, %v636_v13, 0.0 }
  0xd6   : > { %690 = vadd.xlane.f32.xlu1 %v689_v12  ;;  %693 = vadd.xlane.f32.xlu0 %v692_v30  ;;  %v695_v36 = vsel %vm516_vm0, %v637_v27, 0.0 }
  0xda   : > { %696 = vadd.xlane.f32.xlu1 %v695_v36 }
 0x13f   : > { %v640_v34 = vpop.xlane.xlu0 %639 }
 0x140   : > { %v698_v35 = vmul.f32 0.25, %v640_v34 }
 0x142   : > { %v718_v38 = vadd.f32 1e-06, %v698_v35 }
 0x143   : > { %v643_v16 = vpop.xlane.xlu1 %642  ;;  %v646_v17 = vpop.xlane.xlu0 %645 }
 0x144   : > { %v699_v41 = vmul.f32 0.25, %v643_v16  ;;  %v700_v42 = vmul.f32 0.25, %v646_v17  ;;  %1996 = vrsqrt.f32 %v718_v38 }
 0x146   : > { %v719_v43 = vadd.f32 1e-06, %v699_v41  ;;  %v720_v46 = vadd.f32 1e-06, %v700_v42 }
 0x147   : > { %v649_v47 = vpop.xlane.xlu1 %648  ;;  %v652_v48 = vpop.xlane.xlu0 %651 }
 0x148   : > { %1998 = vrsqrt.f32 %v719_v43  ;;  %v701_v20 = vmul.f32 0.25, %v649_v47  ;;  %v702_v21 = vmul.f32 0.25, %v652_v48 }
 0x149   : > { %2000 = vrsqrt.f32 %v720_v46 }
 0x14a   : > { %v721_v51 = vadd.f32 1e-06, %v701_v20  ;;  %v722_v53 = vadd.f32 1e-06, %v702_v21 }
 0x14b   : > { %v655_v55 = vpop.xlane.xlu1 %654  ;;  %v658_v56 = vpop.xlane.xlu0 %657 }
 0x14c   : > { %2002 = vrsqrt.f32 %v721_v51  ;;  %v703_v57 = vmul.f32 0.25, %v655_v55  ;;  %v704_v58 = vmul.f32 0.25, %v658_v56 }
 0x14d   : > { %2004 = vrsqrt.f32 %v722_v53 }
 0x14e   : > { %v723_v24 = vadd.f32 1e-06, %v703_v57  ;;  %v724_v25 = vadd.f32 1e-06, %v704_v58  ;;  %v1997_v1 = vpop.eup %1996 }
 0x14f   : > { %v661_v61 = vpop.xlane.xlu1 %660  ;;  %v664_v63 = vpop.xlane.xlu0 %663  ;;  %v758_v11 = vmul.f32 %v1997_v1, %v2288_v44 }
 0x150   : > { %2006 = vrsqrt.f32 %v723_v24  ;;  %v705_v2 = vmul.f32 0.25, %v661_v61  ;;  %v706_v3 = vmul.f32 0.25, %v664_v63 }
 0x151   : > { %2008 = vrsqrt.f32 %v724_v25 }
 0x152   : > { %v1999_v4 = vpop.eup %1998  ;;  %v725_v28 = vadd.f32 1e-06, %v705_v2  ;;  %v726_v29 = vadd.f32 1e-06, %v706_v3 }
 0x153   : > { %v667_v7 = vpop.xlane.xlu1 %666  ;;  %v670_v9 = vpop.xlane.xlu0 %669  ;;  %v759_v14 = vmul.f32 %v1999_v4, %v2298_v52 }
 0x154   : > { %v2001_v15 = vpop.eup %2000  ;;  %2010 = vrsqrt.f32 %v725_v28  ;;  %v707_v18 = vmul.f32 0.25, %v667_v7  ;;  %v708_v32 = vmul.f32 0.25, %v670_v9 }
 0x155   : > { %v778_v33 = vpack.c.bf16 %v759_v14, %v758_v11  ;;  %2012 = vrsqrt.f32 %v726_v29  ;;  %v760_v37 = vmul.f32 %v2001_v15, %v2291_v45 }
 0x156   : > { %v2003_v12 = vpop.eup %2002  ;;  %v727_v13 = vadd.f32 1e-06, %v707_v18  ;;  %v728_v27 = vadd.f32 1e-06, %v708_v32 }
 0x157   : > { %v673_v30 = vpop.xlane.xlu1 %672  ;;  %1931 = vmatprep.mubr.msk.bf16.mxu0 %vm516_vm0, %v778_v33  ;;  %v676_v36 = vpop.xlane.xlu0 %675  ;;  %v761_v31 = vmul.f32 %v2003_v12, %v2302_v54 }
 0x158   : > { %v2005_v44 = vpop.eup %2004  ;;  %2014 = vrsqrt.f32 %v727_v13  ;;  %v709_v52 = vmul.f32 0.25, %v673_v30  ;;  %v710_v34 = vmul.f32 0.25, %v676_v36 }
 0x159   : > { %v779_v35 = vpack.c.bf16 %v761_v31, %v760_v37  ;;  %2016 = vrsqrt.f32 %v728_v27  ;;  %v762_v43 = vmul.f32 %v2005_v44, %v2310_v62 }
 0x15a   : > { %v2007_v38 = vpop.eup %2006  ;;  %v729_v16 = vadd.f32 1e-06, %v709_v52  ;;  %v730_v17 = vadd.f32 1e-06, %v710_v34 }
 0x15b   : > { %v679_v41 = vpop.xlane.xlu1 %678  ;;  %1932 = vmatmul.mubr.msk.bf16.vlgmr.msra.gmra.mrb[0].mxu0 %vm516_vm0, %v779_v35  ;;  %v682_v42 = vpop.xlane.xlu0 %681  ;;  %v763_v46 = vmul.f32 %v2007_v38, %v2314_v0 }
 0x15c   : > { %v2009_v45 = vpop.eup %2008  ;;  %2018 = vrsqrt.f32 %v729_v16  ;;  %v711_v54 = vmul.f32 0.25, %v679_v41  ;;  %v712_v47 = vmul.f32 0.25, %v682_v42  ;;  %v2447_v42 = vld [vmem:[%s3188_s4] ss:$0 sm:$0xff] }
 0x15d   : > { %v780_v48 = vpack.c.bf16 %v763_v46, %v762_v43  ;;  %2020 = vrsqrt.f32 %v730_v17  ;;  %v764_v56 = vmul.f32 %v2009_v45, %v2322_v8  ;;  %v1113_v17 = vlaneseq }
 0x15e   : > { %v2011_v20 = vpop.eup %2010  ;;  %v731_v21 = vadd.f32 1e-06, %v711_v54  ;;  %v732_v51 = vadd.f32 1e-06, %v712_v47 }
 0x15f   : > { %v685_v53 = vpop.xlane.xlu1 %684  ;;  %1935 = vmatprep.mubr.msk.bf16.mxu0 %vm516_vm0, %v780_v48  ;;  %v688_v55 = vpop.xlane.xlu0 %687  ;;  %v765_v57 = vmul.f32 %v2011_v20, %v2326_v10  ;;  %v1114_v41 = vshrl.u32 %v1113_v17, 7 }
 0x160   : > { %v2013_v62 = vpop.eup %2012  ;;  %2022 = vrsqrt.f32 %v731_v21  ;;  %v713_v0 = vmul.f32 0.25, %v685_v53  ;;  %v714_v58 = vmul.f32 0.25, %v688_v55 }
 0x161   : > { %v781_v24 = vpack.c.bf16 %v765_v57, %v764_v56  ;;  %2024 = vrsqrt.f32 %v732_v51  ;;  %v766_v3 = vmul.f32 %v2013_v62, %v2334_v23  ;;  %v1158_v45 = vsub.s32 0, %v1114_v41 }
 0x162   : > { %v2015_v25 = vpop.eup %2014  ;;  %v733_v61 = vadd.f32 1e-06, %v713_v0  ;;  %v734_v63 = vadd.f32 1e-06, %v714_v58  ;;  %v1266_v47 = vsub.s32 3, %v1114_v41  ;;  %v1230_v21 = vsub.s32 2, %v1114_v41 }
 0x163   : > { %v691_v1 = vpop.xlane.xlu1 %690  ;;  %1936 = vmatmul.mubr.msk.bf16.gmra.mrb[4].mxu0 %vm516_vm0, %v781_v24  ;;  %v694_v2 = vpop.xlane.xlu0 %693  ;;  %v767_v4 = vmul.f32 %v2015_v25, %v2338_v26  ;;  %v1302_v55 = vsub.s32 5, %v1114_v41  ;;  %v1338_v56 = vsub.s32 6, %v1114_v41  ;;  %v1374_v57 = vsub.s32 7, %v1114_v41  ;;  %v2472_v25 = vld [vmem:[%s3190_s6] ss:$0 sm:$0xff] }
 0x164   : > { %v2017_v8 = vpop.eup %2016  ;;  %2026 = vrsqrt.f32 %v733_v61  ;;  %v715_v10 = vmul.f32 0.25, %v691_v1  ;;  %v716_v28 = vmul.f32 0.25, %v694_v2 }
 0x165   : > { %v782_v29 = vpack.c.bf16 %v767_v4, %v766_v3  ;;  %2028 = vrsqrt.f32 %v734_v63  ;;  %v768_v15 = vmul.f32 %v2017_v8, %v2346_v39 }
 0x166   : > { %v2019_v7 = vpop.eup %2018  ;;  %v735_v9 = vadd.f32 1e-06, %v715_v10  ;;  %v736_v11 = vadd.f32 1e-06, %v716_v28 }
 0x167   : > { %v697_v14 = vpop.xlane.xlu1 %696  ;;  %1939 = vmatprep.mubr.msk.bf16.mxu0 %vm516_vm0, %v782_v29  ;;  %v769_v18 = vmul.f32 %v2019_v7, %v2350_v40  ;;  %v2021_v32 = vpop.eup %2020 }
 0x168   : > { %2030 = vrsqrt.f32 %v735_v9  ;;  %v717_v23 = vmul.f32 0.25, %v697_v14  ;;  %v770_v13 = vmul.f32 %v2021_v32, %v2358_v49 }
 0x169   : > { %v783_v26 = vpack.c.bf16 %v769_v18, %v768_v15  ;;  %2032 = vrsqrt.f32 %v736_v11 }
 0x16a   : > { %v2023_v33 = vpop.eup %2022  ;;  %v737_v12 = vadd.f32 1e-06, %v717_v23 }
 0x16b   : > { %1940 = vmatmul.mubr.msk.bf16.gmra.mrb[8].mxu0 %vm516_vm0, %v783_v26  ;;  %v771_v27 = vmul.f32 %v2023_v33, %v2362_v50  ;;  %v2025_v30 = vpop.eup %2024 }
 0x16c   : > { %2034 = vrsqrt.f32 %v737_v12  ;;  %v772_v39 = vmul.f32 %v2025_v30, %v2370_v59 }
 0x16d   : > { %v784_v36 = vpack.c.bf16 %v771_v27, %v770_v13 }
 0x16e   : > { %v2027_v37 = vpop.eup %2026 }
 0x16f   : > { %1943 = vmatprep.mubr.msk.bf16.mxu1 %vm516_vm0, %v784_v36  ;;  %v773_v40 = vmul.f32 %v2027_v37, %v2374_v60  ;;  %v2029_v31 = vpop.eup %2028 }
 0x170   : > { %v774_v49 = vmul.f32 %v2029_v31, %v2382_v5  ;;  %v1115_v5 = vsub.s32 4, %v1114_v41 }
 0x171   : > { %v785_v44 = vpack.c.bf16 %v773_v40, %v772_v39 }
 0x172   : > { %v2031_v52 = vpop.eup %2030 }
 0x173   : > { %1944 = vmatmul.mubr.msk.bf16.vlgmr.msra.gmra.mrb[0].mxu1 %vm516_vm0, %v785_v44  ;;  %v775_v50 = vmul.f32 %v2031_v52, %v2386_v6  ;;  %v2033_v34 = vpop.eup %2032  ;;  %v1111_v6 = vld [vmem:[%s3189_s5] sm:$0xff] }
 0x174   : > { %v776_v59 = vmul.f32 %v2033_v34, %v2394_v19  ;;  %v944_v19 = vstv %s943_s22  ;;  %v2449_v43 = vrot.slane %v1111_v6, %v1115_v5  ;;  %v2474_v61 = vrot.slane %v1111_v6, %v1158_v45  ;;  %s491_s22 = sadd.s32 %s1862_s20, %s3263_s27 }
 0x175   : > { %v786_v35 = vpack.c.bf16 %v775_v50, %v774_v49  ;;  %vm2455_vm2 = vcmp.eq.s32.totalorder %v944_v19, 1  ;;  %v2480_v3 = vrot.slane %v1111_v6, %v1266_v47  ;;  %v2482_v8 = vrot.slane %v1111_v6, %v1230_v21  ;;  %s492_s25 = scalar_lea.vmem %s3192_s8, %s491_s22 }
 0x176   : > { %v2035_v38 = vpop.eup %2034  ;;  %v2484_v28 = vrot.slane %v1111_v6, %v1302_v55  ;;  %v2486_v29 = vrot.slane %v1111_v6, %v1338_v56  ;;  %v2488_v7 = vrot.slane %v1111_v6, %v1374_v57 }
 0x177   : > { %1947 = vmatprep.mubr.msk.bf16.mxu1 %vm516_vm0, %v786_v35  ;;  %v777_v60 = vmul.f32 %v2035_v38, %v2398_v22  ;;  %v1194_v22 = vsub.s32 1, %v1114_v41 }
 0x179   : > { %v787_v16 = vpack.c.bf16 %v777_v60, %v776_v59  ;;  %v2463_v58 = vrot.slane %v1111_v6, %v1194_v22 }
 0x17b   : > { %1948 = vmatmul.mubr.msk.bf16.gmra.mrb[4].mxu1 %vm516_vm0, %v787_v16 }
 0x22e   : > { %v1933_v46 = vpop.f32.mrb[0].mxu0 }
 0x22f   : > { %v2453_v54 = vadd.f32 %v1933_v46, %v2447_v42  ;;  %v864_v48 = vpop.f32.mrb[1].mxu0 }
 0x230   : > { %v865_v51 = vadd.f32 %v2447_v42, %v864_v48  ;;  %v1934_v53 = vpop.f32.mrb[2].mxu0 }
 0x231   : > { %v993_v62 = vrot.slane %v2453_v54, 7  ;;  %v1117_v0 = vmul.f32 %v2449_v43, %v2453_v54  ;;  %v867_v24 = vpop.f32.mrb[3].mxu0  ;;  %v876_v1 = vadd.f32 %v1934_v53, %v2447_v42  ;;  %v1054_v12 = vrot.slane %v2453_v54, 1 }
 0x232   : > { %v949_v63 = vsel %vm2455_vm2, 0.0, %v865_v51  ;;  %v868_v2 = vadd.f32 %v2447_v42, %v867_v24  ;;  %v2502_v13 = vmul.f32 %v2463_v58, %v2453_v54 }
 0x233   : > { %v990_v4 = vrot.slane %v949_v63, 7  ;;  %v994_v10 = vrot.slane %v876_v1, 7  ;;  %v1041_v9 = vsel %vm989_vm3, 0.0, %v993_v62  ;;  %v1140_v11 = vadd.f32 %v2472_v25, %v1117_v0 }
 0x234   : > { %v1118_v23 = vmul.f32 %v2449_v43, %v876_v1  ;;  %v950_v26 = vsel %vm2455_vm2, 0.0, %v868_v2  ;;  %v1055_v27 = vrot.slane %v876_v1, 1  ;;  %v1051_v37 = vrot.slane %v949_v63, 1 }
 0x235   : > { %v1040_v14 = vsel %vm989_vm3, 0.0, %v990_v4  ;;  %v995_v32 = vsel %vm989_vm3, %v993_v62, %v994_v10  ;;  %v991_v30 = vrot.slane %v950_v26, 7  ;;  %v1196_v40 = vmul.f32 %v2463_v58, %v949_v63 }
 0x236   : > { %v1160_v18 = vmul.f32 %v2474_v61, %v1040_v14  ;;  %v1937_v33 = vpop.f32.mrb[4].mxu0  ;;  %v1052_v31 = vrot.slane %v950_v26, 1  ;;  %v1162_v52 = vmul.f32 %v2474_v61, %v1041_v9  ;;  %v2507_v49 = vmul.f32 %v2480_v3, %v1041_v9 }
 0x237   : > { %v880_v36 = vpop.f32.mrb[5].mxu0  ;;  %v992_v50 = vsel %vm989_vm3, %v990_v4, %v991_v30  ;;  %v2511_v34 = vadd.f32 %v1937_v33, %v2447_v42  ;;  %v1141_v59 = vadd.f32 %v2472_v25, %v1118_v23  ;;  %v1102_v17 = vsel %vm1050_vm4, %v1055_v27, 0.0 }
 0x238   : > { %v1176_v39 = vadd.f32 %v1160_v18, %v1140_v11  ;;  %v1938_v44 = vpop.f32.mrb[6].mxu0  ;;  %v1053_v60 = vsel %vm1050_vm4, %v1051_v37, %v1052_v31  ;;  %v1161_v16 = vmul.f32 %v2474_v61, %v992_v50  ;;  %v2518_v41 = vmul.f32 %v2463_v58, %v876_v1  ;;  %v2673_v37 = vld [vmem:[%s3189_s5 + $0x8] ss:$0 sm:$0xff] }
 0x239   : > { %v883_v35 = vpop.f32.mrb[7].mxu0  ;;  %v1101_v5 = vsel %vm1050_vm4, %v1052_v31, 0.0  ;;  %v1232_v6 = vmul.f32 %v2482_v8, %v1053_v60  ;;  %v1197_v22 = vmul.f32 %v2463_v58, %v950_v26  ;;  %v1121_v46 = vmul.f32 %v2449_v43, %v2511_v34 }
 0x23a   : > { %v1212_v38 = vadd.f32 %v1196_v40, %v1176_v39  ;;  %v1177_v19 = vadd.f32 %v1161_v16, %v1141_v59  ;;  %v2526_v45 = vadd.f32 %v2447_v42, %v880_v36  ;;  %v2529_v47 = vadd.f32 %v1938_v44, %v2447_v42 }
 0x23b   : > { %v2532_v48 = vadd.f32 %v2447_v42, %v883_v35  ;;  %v2535_v20 = vsel %vm1050_vm4, %v1054_v12, %v1055_v27  ;;  %v1163_v21 = vmul.f32 %v2474_v61, %v995_v32  ;;  %v1233_v53 = vmul.f32 %v2482_v8, %v1101_v5 }
 0x23c   : > { %v1248_v54 = vadd.f32 %v1232_v6, %v1212_v38  ;;  %v1213_v51 = vadd.f32 %v1197_v22, %v1177_v19  ;;  %v1119_v55 = vmul.f32 %v2449_v43, %v2526_v45  ;;  %v2542_v57 = vmul.f32 %v2482_v8, %v1102_v17 }
 0x23d   : > { %v2545_v62 = vmul.f32 %v2484_v28, %v1102_v17  ;;  %v1269_v0 = vmul.f32 %v2480_v3, %v995_v32  ;;  %v2551_v2 = vmul.f32 %v2463_v58, %v2511_v34  ;;  %v1120_v10 = vmul.f32 %v2449_v43, %v2532_v48 }
 0x23e   : > { %v1941_v56 = vpop.f32.mrb[8].mxu0  ;;  %v1249_v1 = vadd.f32 %v1233_v53, %v1213_v51  ;;  %v1142_v4 = vadd.f32 %v2472_v25, %v1119_v55  ;;  %v1144_v11 = vadd.f32 %v2472_v25, %v1121_v46  ;;  %v1122_v14 = vmul.f32 %v2449_v43, %v2529_v47 }
 0x23f   : > { %v896_v63 = vpop.f32.mrb[9].mxu0  ;;  %v2560_v18 = vadd.f32 %v1941_v56, %v2447_v42  ;;  %v1143_v12 = vadd.f32 %v2472_v25, %v1120_v10  ;;  %v996_v30 = vrot.slane %v2526_v45, 7  ;;  %v1200_v36 = vmul.f32 %v2463_v58, %v2526_v45 }
 0x240   : > { %v1942_v9 = vpop.f32.mrb[10].mxu0  ;;  %v2563_v32 = vadd.f32 %v2447_v42, %v896_v63  ;;  %v1285_v26 = vadd.f32 %v1269_v0, %v1249_v1  ;;  %v2565_v33 = vadd.f32 %v1162_v52, %v1142_v4  ;;  %v2580_v40 = vmul.f32 %v2463_v58, %v2529_v47 }
 0x241   : > { %v899_v23 = vpop.f32.mrb[11].mxu0  ;;  %v2569_v27 = vadd.f32 %v1942_v9, %v2447_v42  ;;  %v997_v31 = vrot.slane %v2532_v48, 7  ;;  %v2583_v44 = vadd.f32 %v1163_v21, %v1143_v12  ;;  %v1125_v52 = vmul.f32 %v2449_v43, %v2560_v18 }
 0x242   : > { %v2576_v39 = vadd.f32 %v2447_v42, %v899_v23  ;;  %v2588_v50 = vadd.f32 %v2472_v25, %v1122_v14  ;;  %v2592_v35 = vmul.f32 %v2463_v58, %v2532_v48  ;;  %v2597_v59 = vmul.f32 %v2463_v58, %v2560_v18 }
 0x243   : > { %v1123_v16 = vmul.f32 %v2449_v43, %v2563_v32  ;;  %v2604_v17 = vmul.f32 %v2463_v58, %v2563_v32  ;;  %v1126_v5 = vmul.f32 %v2449_v43, %v2569_v27  ;;  %v1057_v21 = vrot.slane %v2526_v45, 1 }
 0x244   : > { %v1124_v19 = vmul.f32 %v2449_v43, %v2576_v39  ;;  %v1058_v51 = vrot.slane %v2532_v48, 1  ;;  %v2616_v53 = vadd.f32 %v2472_v25, %v1125_v52  ;;  %v1284_v0 = vadd.f32 %v2507_v49, %v1248_v54 }
 0x245   : > { %v2625_v1 = vmul.f32 %v2463_v58, %v2569_v27  ;;  %v2632_v10 = vsel %vm989_vm3, 0.0, %v996_v30  ;;  %v1146_v23 = vadd.f32 %v2472_v25, %v1123_v16  ;;  %v2637_v12 = vadd.f32 %v2472_v25, %v1126_v5 }
 0x246   : > { %v1945_v6 = vpop.f32.mrb[0].mxu1  ;;  %v1059_v9 = vsel %vm1050_vm4, %v1057_v21, %v1058_v51  ;;  %v2642_v54 = vmul.f32 %v2463_v58, %v2576_v39  ;;  %v2645_v52 = vadd.f32 %v2472_v25, %v1124_v19  ;;  %v1304_v16 = vmul.f32 %v2484_v28, %v2535_v20 }
 0x247   : > { %v2611_v22 = vadd.f32 %v1945_v6, %v2447_v42  ;;  %v912_v46 = vpop.f32.mrb[1].mxu1  ;;  %3201 = vst [vmem:[#allocation4_spill] sm:$0xff] %v2625_v1  ;;  %v1340_v55 = vmul.f32 %v2486_v29, %v2632_v10  ;;  %v1164_v19 = vmul.f32 %v2474_v61, %v2632_v10  ;;  %v1377_v1 = vmul.f32 %v2488_v7, %v2532_v48 }
 0x248   : > { %v2620_v56 = vadd.f32 %v2447_v42, %v912_v46  ;;  %v1946_v63 = vpop.f32.mrb[2].mxu1  ;;  %3203 = vst [vmem:[#allocation6_spill] sm:$0xff] %v2642_v54  ;;  %v1234_v46 = vmul.f32 %v2482_v8, %v2535_v20  ;;  %v1320_v49 = vadd.f32 %v1304_v16, %v1284_v0  ;;  %v2666_v20 = vsel %vm989_vm3, %v996_v30, %v997_v31 }
 0x249   : > { %3200 = vst [vmem:[#allocation3_spill] sm:$0xff] %v2611_v22  ;;  %v2629_v4 = vmul.f32 %v2463_v58, %v2611_v22  ;;  %v915_v14 = vpop.f32.mrb[3].mxu1  ;;  %v1129_v5 = vmul.f32 %v2449_v43, %v2611_v22  ;;  %v2660_v6 = vadd.f32 %v1946_v63, %v2447_v42  ;;  %v1236_v0 = vmul.f32 %v2482_v8, %v1059_v9 }
 0x24a   : > { %v2663_v38 = vadd.f32 %v2447_v42, %v915_v14  ;;  %v1127_v21 = vmul.f32 %v2449_v43, %v2620_v56  ;;  %v1180_v16 = vadd.f32 %v1164_v19, %v1144_v11  ;;  %v1321_v63 = vadd.f32 %v2545_v62, %v1285_v26 }
 0x24b   : > { %3202 = vst [vmem:[#allocation5_spill] sm:$0xff] %v2629_v4  ;;  %v1356_v14 = vadd.f32 %v1340_v55, %v1320_v49  ;;  %v1376_v30 = vmul.f32 %v2488_v7, %v2526_v45  ;;  %v1130_v31 = vmul.f32 %v2449_v43, %v2660_v6  ;;  %v2683_v24 = vmul.f32 %v2463_v58, %v2660_v6 }
 0x24c   : > { %v1216_v4 = vadd.f32 %v1200_v36, %v1180_v16  ;;  %v2689_v11 = vmul.f32 %v2463_v58, %v2663_v38  ;;  %v1103_v62 = vsel %vm1050_vm4, %v1058_v51, 0.0  ;;  %v1341_v26 = vmul.f32 %v2486_v29, %v2666_v20 }
 0x24d   : > { %3204 = vst [vmem:[#allocation7_spill] sm:$0xff] %v2683_v24  ;;  %v3206_v45 = vstv %s2467_s13  ;;  %v2704_v19 = vmul.f32 %v2463_v58, %v2620_v56  ;;  %v1392_v36 = vadd.f32 %v1376_v30, %v1356_v14  ;;  %v1412_v16 = vmul.f32 %v2673_v37, %v1059_v9 }
 0x24e   : > { %v1949_v60 = vpop.f32.mrb[4].mxu1  ;;  %3205 = vst [vmem:[#allocation8_spill] sm:$0xff] %v2689_v11  ;;  %vm2696_vm5 = vcmp.eq.s32.totalorder %v3206_v45, 1  ;;  %v2708_v24 = vadd.f32 %v2472_v25, %v1130_v31  ;;  %v2711_v11 = vadd.f32 %v2472_v25, %v1129_v5  ;;  %v1252_v45 = vadd.f32 %v1236_v0, %v1216_v4 }
 0x24f   : > { %v2685_v15 = vpop.f32.mrb[5].mxu1  ;;  %3209 = vst [vmem:[#allocation9_spill] sm:$0xff] %v2704_v19  ;;  %v1357_v22 = vadd.f32 %v1341_v26, %v1321_v63  ;;  %v2715_v54 = vadd.f32 %v1412_v16, %v1392_v36  ;;  %v1413_v58 = vmul.f32 %v2673_v37, %v1103_v62  ;;  %v1165_v14 = vmul.f32 %v2474_v61, %v2666_v20 }
 0x250   : > { %v2700_v49 = vpop.f32.mrb[6].mxu1  ;;  %3210 = vst [vmem:[#allocation10_spill] sm:$0xff] %v2708_v24  ;;  %v3211_v30 = vrot.slane %v2511_v34, 7  ;;  %v1060_v5 = vrot.slane %v2511_v34, 1  ;;  %v1061_v4 = vrot.slane %v2529_v47, 1  ;;  %v2727_v48 = vadd.f32 %v2472_v25, %v1127_v21 }
 0x251   : > { %v931_v51 = vpop.f32.mrb[7].mxu1  ;;  %v1393_v24 = vadd.f32 %v1377_v1, %v1357_v22  ;;  %v1306_v63 = vmul.f32 %v2484_v28, %v1059_v9  ;;  %1460 = vrot.lane.b32.xlu0 %v2715_v54, %s2076_s14  ;;  %v1181_v26 = vadd.f32 %v1165_v14, %v2588_v50  ;;  %v1214_v22 = vadd.f32 %v2502_v13, %v2565_v33 }
 0x252   : > { %v1043_v31 = vsel %vm989_vm3, 0.0, %v3211_v30  ;;  %v1062_v21 = vsel %vm1050_vm4, %v1060_v5, %v1061_v4  ;;  %v1237_v9 = vmul.f32 %v2482_v8, %v1103_v62  ;;  %v1270_v50 = vmul.f32 %v2480_v3, %v2632_v10 }
 0x253   : > { %v1166_v0 = vmul.f32 %v2474_v61, %v1043_v31  ;;  %v2736_v36 = vadd.f32 %v1413_v58, %v1393_v24  ;;  %v1217_v30 = vadd.f32 %v2592_v35, %v1181_v26  ;;  %v1250_v19 = vadd.f32 %v1234_v46, %v1214_v22 }
 0x254   : > { %v1009_v14 = vrot.slane %v2663_v38, 7  ;;  %v1238_v13 = vmul.f32 %v2482_v8, %v1062_v21  ;;  %v937_v33 = vadd.f32 %v1949_v60, %v2447_v42  ;;  %v3212_v35 = vrot.slane %v2563_v32, 7 }
 0x255   : > { %v1182_v16 = vadd.f32 %v1166_v0, %v1146_v23  ;;  %1462 = vrot.lane.b32.xlu1 %v2736_v36, %s2076_s14  ;;  %v2751_v23 = vadd.f32 %v1237_v9, %v1217_v30  ;;  %v1286_v58 = vadd.f32 %v1270_v50, %v1250_v19  ;;  %v1064_v10 = vrot.slane %v2576_v39, 1 }
 0x256   : > { %v2756_v46 = vsel %vm989_vm3, 0.0, %v3212_v35  ;;  %v1128_v5 = vmul.f32 %v2449_v43, %v2663_v38  ;;  %v1063_v26 = vrot.slane %v2563_v32, 1  ;;  %v2766_v60 = vmul.f32 %v2484_v28, %v1103_v62 }
 0x257   : > { %v1218_v24 = vadd.f32 %v2551_v2, %v1182_v16  ;;  %v1272_v2 = vmul.f32 %v2480_v3, %v1043_v31  ;;  %v1322_v19 = vadd.f32 %v1306_v63, %v1286_v58  ;;  %v1342_v22 = vmul.f32 %v2486_v29, %v1043_v31 }
 0x258   : > { %v2771_v16 = vsel %vm2696_vm5, 0.0, %v937_v33  ;;  %v1308_v9 = vmul.f32 %v2484_v28, %v1062_v21  ;;  %v1065_v30 = vsel %vm1050_vm4, %v1063_v26, %v1064_v10  ;;  %v1378_v62 = vmul.f32 %v2488_v7, %v2511_v34 }
 0x259   : > { %v2761_v0 = vadd.f32 %v1238_v13, %v1218_v24  ;;  %v1288_v50 = vadd.f32 %v1272_v2, %v1252_v45  ;;  %v1168_v13 = vmul.f32 %v2474_v61, %v2756_v46  ;;  %v1358_v24 = vadd.f32 %v1342_v22, %v1322_v19 }
 0x25a   : > { %v1414_v31 = vmul.f32 %v2673_v37, %v1062_v21  ;;  %v1344_v63 = vmul.f32 %v2486_v29, %v2756_v46  ;;  %v1017_v33 = vrot.slane %v2771_v16, 7  ;;  %v1380_v35 = vmul.f32 %v2488_v7, %v2563_v32 }
 0x25b   : > { %v1324_v58 = vadd.f32 %v1308_v9, %v1288_v50  ;;  %v1184_v45 = vadd.f32 %v1168_v13, %v2616_v53  ;;  %v1394_v26 = vadd.f32 %v1378_v62, %v1358_v24  ;;  %v2790_v2 = vadd.f32 %v2447_v42, %v2685_v15 }
 0x25c   : > { %v940_v19 = vadd.f32 %v2700_v49, %v2447_v42  ;;  %v2795_v21 = vadd.f32 %v2447_v42, %v931_v51  ;;  %v1240_v22 = vmul.f32 %v2482_v8, %v1065_v30  ;;  %v3213_v50 = vrot.slane %v2529_v47, 7 }
 0x25d   : > { %v1360_v1 = vadd.f32 %v1344_v63, %v1324_v58  ;;  %v1220_v9 = vadd.f32 %v2604_v17, %v1184_v45  ;;  %v3214_v53 = vrot.slane %v2511_v34, 7  ;;  %v2805_v15 = vadd.f32 %v2472_v25, %v1128_v5 }
 0x25e   : > { %v2807_v24 = vadd.f32 %v1414_v31, %v1394_v26  ;;  %v3195_v49 = vrot.slane %v2790_v2, 7  ;;  %v1131_v42 = vmul.f32 %v2449_v43, %v2790_v2  ;;  %v1416_v62 = vmul.f32 %v2673_v37, %v1065_v30 }
 0x25f   : > { %v1001_v13 = vsel %vm989_vm3, %v3214_v53, %v3213_v50  ;;  %v1396_v51 = vadd.f32 %v1380_v35, %v1360_v1  ;;  %v2813_v17 = vadd.f32 %v1240_v22, %v1220_v9  ;;  %v2817_v34 = vsel %vm2696_vm5, 0.0, %v940_v19 }
 0x260   : > { %1464 = vrot.lane.b32.xlu1 %v2807_v24, %s2076_s14  ;;  %v2825_v31 = vsel %vm989_vm3, 0.0, %v3195_v49  ;;  %v2828_v1 = vadd.f32 %v2472_v25, %v1131_v42  ;;  %v1018_v63 = vrot.slane %v2817_v34, 7  ;;  %v2832_v58 = vsel %vm989_vm3, 0.0, %v1017_v33 }
 0x261   : > { %v1310_v55 = vmul.f32 %v2484_v28, %v1065_v30  ;;  %v2835_v35 = vadd.f32 %v1416_v62, %v1396_v51  ;;  %v1104_v45 = vsel %vm1050_vm4, %v1061_v4, 0.0  ;;  %v1132_v9 = vmul.f32 %v2449_v43, %v2795_v21 }
 0x262   : > { %v2842_v19 = vsel %vm989_vm3, %v1017_v33, %v1018_v63  ;;  %v2851_v30 = vmul.f32 %v2480_v3, %v2825_v31  ;;  %v1167_v4 = vmul.f32 %v2474_v61, %v1001_v13  ;;  %v1215_v33 = vadd.f32 %v2518_v41, %v2583_v44 }
 0x263   : > { %1468 = vrot.lane.b32.xlu0 %v2835_v35, %s2076_s14  ;;  %v2859_v42 = vadd.f32 %v2472_v25, %v1132_v9  ;;  %v1239_v43 = vmul.f32 %v2482_v8, %v1104_v45  ;;  %v1271_v51 = vmul.f32 %v2480_v3, %v2666_v20  ;;  %v1309_v63 = vmul.f32 %v2484_v28, %v1104_v45 }
 0x264   : > { %v1251_v62 = vadd.f32 %v2542_v57, %v1215_v33  ;;  %v1183_v49 = vadd.f32 %v1167_v4, %v2645_v52  ;;  %v3215_v22 = vrot.slane %v2560_v18, 7  ;;  %v1066_v44 = vrot.slane %v2560_v18, 1 }
 0x265   : > { %v1067_v25 = vrot.slane %v2569_v27, 1  ;;  %v1274_v5 = vmul.f32 %v2480_v3, %v2756_v46  ;;  %v1343_v57 = vmul.f32 %v2486_v29, %v1001_v13  ;;  %v3216_v52 = vrot.slane %v2576_v39, 7 }
 0x266   : > { %v1045_v41 = vsel %vm989_vm3, 0.0, %v3215_v22  ;;  %v1287_v20 = vadd.f32 %v1271_v51, %v1251_v62  ;;  %v1219_v33 = vadd.f32 %v2580_v40, %v1183_v49  ;;  %v3217_v4 = vrot.slane %v2563_v32, 7 }
 0x267   : > { %v1170_v9 = vmul.f32 %v2474_v61, %v1045_v41  ;;  %v1379_v50 = vmul.f32 %v2488_v7, %v2529_v47  ;;  %v1068_v26 = vsel %vm1050_vm4, %v1066_v44, %v1067_v25  ;;  %v1290_v53 = vadd.f32 %v1274_v5, %v2761_v0 }
 0x268   : > { %v1004_v22 = vsel %vm989_vm3, %v3217_v4, %v3216_v52  ;;  %v1323_v51 = vadd.f32 %v2766_v60, %v1287_v20  ;;  %v1415_v62 = vmul.f32 %v2673_v37, %v1104_v45  ;;  %v1255_v40 = vadd.f32 %v1239_v43, %v1219_v33 }
 0x269   : > { %v1186_v46 = vadd.f32 %v1170_v9, %v2727_v48  ;;  %v1105_v32 = vsel %vm1050_vm4, %v1064_v10, 0.0  ;;  %v1242_v49 = vmul.f32 %v2482_v8, %v1068_v26  ;;  %v1326_v52 = vadd.f32 %v1310_v55, %v1290_v53 }
 0x26a   : > { %v1346_v47 = vmul.f32 %v2486_v29, %v1045_v41  ;;  %v1359_v4 = vadd.f32 %v1343_v57, %v1323_v51  ;;  %v1312_v0 = vmul.f32 %v2484_v28, %v1068_v26  ;;  %v1382_v48 = vmul.f32 %v2488_v7, %v2560_v18 }
 0x26b   : > { %v1222_v44 = vadd.f32 %v2597_v59, %v1186_v46  ;;  %v1273_v60 = vmul.f32 %v2480_v3, %v1001_v13  ;;  %v1418_v45 = vmul.f32 %v2673_v37, %v1068_v26  ;;  %v1241_v10 = vmul.f32 %v2482_v8, %v1105_v32 }
 0x26c   : > { %v1362_v5 = vadd.f32 %v1346_v47, %v1326_v52  ;;  %v1395_v55 = vadd.f32 %v1379_v50, %v1359_v4  ;;  %v1169_v59 = vmul.f32 %v2474_v61, %v1004_v22  ;;  %v3218_v9 = vrot.slane %v2569_v27, 7 }
 0x26d   : > { %v2900_v43 = vadd.f32 %v1242_v49, %v1222_v44  ;;  %v1289_v53 = vadd.f32 %v1273_v60, %v2751_v23  ;;  %v3219_v20 = vrot.slane %v2560_v18, 7  ;;  %v1311_v33 = vmul.f32 %v2484_v28, %v1105_v32 }
 0x26e   : > { %v1398_v13 = vadd.f32 %v1382_v48, %v1362_v5  ;;  %v1345_v26 = vmul.f32 %v2486_v29, %v1004_v22  ;;  %v1275_v46 = vmul.f32 %v2480_v3, %v1004_v22  ;;  %v2915_v51 = vadd.f32 %v1415_v62, %v1395_v55  ;;  %v3220_v62 = vld [vmem:[#allocation6_spill] sm:$0xff] }
 0x26f   : > { %v2910_v57 = vsel %vm989_vm3, %v3219_v20, %v3218_v9  ;;  %v1325_v50 = vadd.f32 %v1309_v63, %v1289_v53  ;;  %v1381_v23 = vmul.f32 %v2488_v7, %v2576_v39  ;;  %v1185_v49 = vadd.f32 %v1169_v59, %v2637_v12  ;;  %v3222_v20 = vld [vmem:[#allocation4_spill] sm:$0xff] }
 0x270   : > { %v2920_v52 = vadd.f32 %v1418_v45, %v1398_v13  ;;  %v1417_v18 = vmul.f32 %v2673_v37, %v1105_v32  ;;  %v1171_v47 = vmul.f32 %v2474_v61, %v2910_v57  ;;  %v1291_v44 = vadd.f32 %v1275_v46, %v1255_v40  ;;  %1466 = vrot.lane.b32.xlu1 %v2915_v51, %s2076_s14 }
 0x271   : > { %v1361_v22 = vadd.f32 %v1345_v26, %v1325_v50  ;;  %v1221_v4 = vadd.f32 %v3220_v62, %v1185_v49  ;;  %v1106_v63 = vsel %vm1050_vm4, %v1067_v25, 0.0  ;;  %v1347_v39 = vmul.f32 %v2486_v29, %v2910_v57 }
 0x272   : > { %1472 = vrot.lane.b32.xlu0 %v2920_v52, %s2076_s14  ;;  %v1327_v12 = vadd.f32 %v1311_v33, %v1291_v44  ;;  %v1187_v32 = vadd.f32 %v1171_v47, %v2805_v15  ;;  %v3221_v48 = vrot.slane %v2620_v56, 7  ;;  %v1069_v60 = vrot.slane %v2620_v56, 1  ;;  %v3223_v47 = vld [vmem:[#allocation3_spill] sm:$0xff] }
 0x273   : > { %v1397_v5 = vadd.f32 %v1381_v23, %v1361_v22  ;;  %v1257_v45 = vadd.f32 %v1241_v10, %v1221_v4  ;;  %v1070_v55 = vrot.slane %v2663_v38, 1  ;;  %v1276_v25 = vmul.f32 %v2480_v3, %v1045_v41 }
 0x274   : > { %v1046_v40 = vsel %vm989_vm3, 0.0, %v3221_v48  ;;  %v1243_v53 = vmul.f32 %v2482_v8, %v1106_v63  ;;  %v1363_v59 = vadd.f32 %v1347_v39, %v1327_v12  ;;  %v1383_v9 = vmul.f32 %v2488_v7, %v2569_v27 }
 0x275   : > { %v1223_v15 = vadd.f32 %v3222_v20, %v1187_v32  ;;  %v2944_v13 = vadd.f32 %v1417_v18, %v1397_v5  ;;  %v1071_v33 = vsel %vm1050_vm4, %v1069_v60, %v1070_v55  ;;  %v1292_v26 = vadd.f32 %v1276_v25, %v2813_v17  ;;  %v3225_v32 = vld [vmem:[#allocation9_spill] sm:$0xff] }
 0x276   : > { %v1172_v10 = vmul.f32 %v2474_v61, %v1046_v40  ;;  %v1399_v46 = vadd.f32 %v1383_v9, %v1363_v59  ;;  %v1419_v50 = vmul.f32 %v2673_v37, %v1106_v63  ;;  %v1348_v23 = vmul.f32 %v2486_v29, %v1046_v40 }
 0x277   : > { %v1259_v41 = vadd.f32 %v1243_v53, %v1223_v15  ;;  %1470 = vrot.lane.b32.xlu1 %v2944_v13, %s2076_s14  ;;  %v1328_v27 = vadd.f32 %v1312_v0, %v1292_v26  ;;  %v1384_v49 = vmul.f32 %v2488_v7, %v2620_v56  ;;  %v3224_v44 = vrot.slane %v3223_v47, 7 }
 0x278   : > { %v1188_v18 = vadd.f32 %v1172_v10, %v2711_v11  ;;  %v2959_v22 = vadd.f32 %v1419_v50, %v1399_v46  ;;  %v1072_v62 = vrot.slane %v3223_v47, 1  ;;  %v1073_v4 = vrot.slane %v2660_v6, 1 }
 0x279   : > { %v1047_v17 = vsel %vm989_vm3, 0.0, %v3224_v44  ;;  %v1244_v12 = vmul.f32 %v2482_v8, %v1071_v33  ;;  %v1364_v0 = vadd.f32 %v1348_v23, %v1328_v27  ;;  %v1278_v60 = vmul.f32 %v2480_v3, %v1046_v40 }
 0x27a   : > { %v1174_v39 = vmul.f32 %v2474_v61, %v1047_v17  ;;  %v1224_v48 = vadd.f32 %v3225_v32, %v1188_v18  ;;  %v1314_v11 = vmul.f32 %v2484_v28, %v1071_v33  ;;  %v1074_v5 = vsel %vm1050_vm4, %v1072_v62, %v1073_v4 }
 0x27b   : > { %v3226_v53 = vrot.slane %v2620_v56, 7  ;;  %1474 = vrot.lane.b32.xlu1 %v2959_v22, %s2076_s14  ;;  %v1400_v9 = vadd.f32 %v1384_v49, %v1364_v0  ;;  %v1420_v20 = vmul.f32 %v2673_v37, %v1071_v33  ;;  %v1294_v40 = vadd.f32 %v1278_v60, %v2900_v43 }
 0x27c   : > { %v1190_v25 = vadd.f32 %v1174_v39, %v2828_v1  ;;  %v1260_v15 = vadd.f32 %v1244_v12, %v1224_v48  ;;  %v1313_v26 = vmul.f32 %v2484_v28, %v1106_v63  ;;  %v1246_v10 = vmul.f32 %v2482_v8, %v1074_v5  ;;  %v3227_v1 = vld [vmem:[#allocation5_spill] sm:$0xff] }
 0x27d   : > { %v1010_v59 = vsel %vm989_vm3, %v3226_v53, %v1009_v14  ;;  %v1107_v50 = vsel %vm1050_vm4, %v1070_v55, 0.0  ;;  %v2983_v56 = vadd.f32 %v1420_v20, %v1400_v9  ;;  %v1330_v14 = vadd.f32 %v1314_v11, %v1294_v40 }
 0x27e   : > { %v1226_v46 = vadd.f32 %v3227_v1, %v1190_v25  ;;  %v1350_v23 = vmul.f32 %v2486_v29, %v1047_v17  ;;  %v1277_v27 = vmul.f32 %v2480_v3, %v2910_v57  ;;  %v1316_v33 = vmul.f32 %v2484_v28, %v1074_v5  ;;  %v3231_v1 = vld [vmem:[#allocation8_spill] sm:$0xff] }
 0x27f   : > { %v1386_v43 = vmul.f32 %v2488_v7, %v3223_v47  ;;  %v1422_v63 = vmul.f32 %v2673_v37, %v1074_v5  ;;  %1476 = vrot.lane.b32.xlu0 %v2983_v56, %s2076_s14  ;;  %v1245_v18 = vmul.f32 %v2482_v8, %v1107_v50  ;;  %v1173_v62 = vmul.f32 %v2474_v61, %v1010_v59 }
 0x280   : > { %v1262_v49 = vadd.f32 %v1246_v10, %v1226_v46  ;;  %v1366_v55 = vadd.f32 %v1350_v23, %v1330_v14  ;;  %v1293_v44 = vadd.f32 %v1277_v27, %v1257_v45  ;;  %v1315_v39 = vmul.f32 %v2484_v28, %v1107_v50  ;;  %v3230_v45 = vld [vmem:[#allocation10_spill] sm:$0xff] }
 0x281   : > { %v1349_v57 = vmul.f32 %v2486_v29, %v1010_v59  ;;  %v3228_v12 = vrot.slane %v2660_v6, 7  ;;  %v3229_v0 = vrot.slane %v3223_v47, 7  ;;  %v1279_v48 = vmul.f32 %v2480_v3, %v1010_v59 }
 0x282   : > { %v1402_v60 = vadd.f32 %v1386_v43, %v1366_v55  ;;  %v1329_v11 = vadd.f32 %v1313_v26, %v1293_v44  ;;  %v1385_v5 = vmul.f32 %v2488_v7, %v2663_v38  ;;  %v1189_v25 = vadd.f32 %v1173_v62, %v3230_v45  ;;  %v3234_v55 = vld [vmem:[#allocation7_spill] sm:$0xff] }
 0x283   : > { %v1013_v32 = vsel %vm989_vm3, %v3229_v0, %v3228_v12  ;;  %v1421_v53 = vmul.f32 %v2673_v37, %v1107_v50  ;;  %v1108_v9 = vsel %vm1050_vm4, %v1073_v4, 0.0  ;;  %v1295_v40 = vadd.f32 %v1279_v48, %v1259_v41 }
 0x284   : > { %v1175_v20 = vmul.f32 %v2474_v61, %v1013_v32  ;;  %v3010_v10 = vadd.f32 %v1422_v63, %v1402_v60  ;;  %v1365_v47 = vadd.f32 %v1349_v57, %v1329_v11  ;;  %v1225_v46 = vadd.f32 %v3231_v1, %v1189_v25 }
 0x285   : > { %v1351_v59 = vmul.f32 %v2486_v29, %v1013_v32  ;;  %v1331_v26 = vadd.f32 %v1315_v39, %v1295_v40  ;;  %v3232_v38 = vrot.slane %v2795_v21, 1  ;;  %v3233_v23 = vrot.slane %v2790_v2, 1 }
 0x286   : > { %v1191_v14 = vadd.f32 %v1175_v20, %v2859_v42  ;;  %v1280_v4 = vmul.f32 %v2480_v3, %v1047_v17  ;;  %1480 = vrot.lane.b32.xlu0 %v3010_v10, %s2076_s14  ;;  %v1401_v61 = vadd.f32 %v1385_v5, %v1365_v47  ;;  %v1261_v41 = vadd.f32 %v1245_v18, %v1225_v46 }
 0x287   : > { %v1077_v50 = vsel %vm1050_vm4, %v3233_v23, %v3232_v38  ;;  %v1247_v27 = vmul.f32 %v2482_v8, %v1108_v9  ;;  %v1387_v43 = vmul.f32 %v2488_v7, %v2660_v6  ;;  %v1367_v63 = vadd.f32 %v1351_v59, %v1331_v26 }
 0x288   : > { %v1423_v42 = vmul.f32 %v2673_v37, %v1108_v9  ;;  %v1227_v44 = vadd.f32 %v3234_v55, %v1191_v14  ;;  %v1296_v62 = vadd.f32 %v1280_v4, %v1260_v15  ;;  %v3028_v39 = vadd.f32 %v1421_v53, %v1401_v61 }
 0x289   : > { %v1318_v17 = vmul.f32 %v2484_v28, %v1077_v50  ;;  %v3235_v57 = vrot.slane %v2817_v34, 1  ;;  %v3236_v12 = vrot.slane %v2771_v16, 1  ;;  %v1298_v8 = vadd.f32 %v2851_v30, %v1262_v49 }
 0x28a   : > { %v1403_v0 = vadd.f32 %v1387_v43, %v1367_v63  ;;  %v1263_v6 = vadd.f32 %v1247_v27, %v1227_v44  ;;  %v1332_v48 = vadd.f32 %v1316_v33, %v1296_v62  ;;  %v1352_v60 = vmul.f32 %v2486_v29, %v2825_v31  ;;  %1478 = vrot.lane.b32.xlu1 %v3028_v39, %s2076_s14 }
 0x28b   : > { %v1080_v18 = vsel %vm1050_vm4, %v3236_v12, %v3235_v57  ;;  %v1354_v15 = vmul.f32 %v2486_v29, %v2832_v58  ;;  %v1334_v11 = vadd.f32 %v1318_v17, %v1298_v8  ;;  %v3237_v5 = vrot.slane %v2795_v21, 7 }
 0x28c   : > { %v3238_v45 = vrot.slane %v2790_v2, 7  ;;  %v1281_v30 = vmul.f32 %v2480_v3, %v1013_v32  ;;  %v1390_v33 = vmul.f32 %v2488_v7, %v2771_v16  ;;  %v3051_v49 = vadd.f32 %v1423_v42, %v1403_v0 }
 0x28d   : > { %v1368_v31 = vadd.f32 %v1352_v60, %v1332_v48  ;;  %v1388_v58 = vmul.f32 %v2488_v7, %v2790_v2  ;;  %v1317_v53 = vmul.f32 %v2484_v28, %v1108_v9  ;;  %v1370_v20 = vadd.f32 %v1354_v15, %v1334_v11 }
 0x28e   : > { %v1016_v25 = vsel %vm989_vm3, %v3238_v45, %v3237_v5  ;;  %v3239_v40 = vmov %v3232_v38  ;;  %v1297_v1 = vadd.f32 %v1281_v30, %v1261_v41  ;;  %v1424_v32 = vmul.f32 %v2673_v37, %v1077_v50  ;;  %1482 = vrot.lane.b32.xlu1 %v3051_v49, %s2076_s14 }
 0x28f   : > { %v1109_v47 = vsel %vm1050_vm4, %v3239_v40, 0.0  ;;  %v1404_v46 = vadd.f32 %v1388_v58, %v1368_v31  ;;  %v1283_v59 = vmul.f32 %v2480_v3, %v1016_v25  ;;  %v1406_v16 = vadd.f32 %v1390_v33, %v1370_v20 }
 0x290   : > { %v1426_v26 = vmul.f32 %v2673_v37, %v1080_v18  ;;  %v1333_v2 = vadd.f32 %v1317_v53, %v1297_v1  ;;  %v1353_v9 = vmul.f32 %v2486_v29, %v1016_v25  ;;  %v1319_v38 = vmul.f32 %v2484_v28, %v1109_v47 }
 0x291   : > { %v3065_v14 = vadd.f32 %v1424_v32, %v1404_v46  ;;  %v1299_v23 = vadd.f32 %v1283_v59, %v1263_v6  ;;  %v1389_v3 = vmul.f32 %v2488_v7, %v2795_v21  ;;  %v1355_v41 = vmul.f32 %v2486_v29, %v2842_v19 }
 0x292   : > { %v3068_v4 = vadd.f32 %v1426_v26, %v1406_v16  ;;  %v1369_v61 = vadd.f32 %v1353_v9, %v1333_v2  ;;  %v3240_v27 = vmov %v3235_v57  ;;  %v1425_v63 = vmul.f32 %v2673_v37, %v1109_v47 }
 0x293   : > { %1484 = vrot.lane.b32.xlu0 %v3065_v14, %s2076_s14  ;;  %v1335_v50 = vadd.f32 %v1319_v38, %v1299_v23  ;;  %v1110_v43 = vsel %vm1050_vm4, %v3240_v27, 0.0  ;;  %v1391_v42 = vmul.f32 %v2488_v7, %v2817_v34 }
 0x294   : > { %v1405_v28 = vadd.f32 %v1389_v3, %v1369_v61  ;;  %v1427_v62 = vmul.f32 %v2673_v37, %v1110_v43 }
 0x295   : > { %v1371_v55 = vadd.f32 %v1355_v41, %v1335_v50 }
 0x296   : > { %v3082_v21 = vadd.f32 %v1425_v63, %v1405_v28 }
 0x297   : > { %1488 = vrot.lane.b32.xlu0 %v3068_v4, %s2076_s14  ;;  %v1407_v44 = vadd.f32 %v1391_v42, %v1371_v55 }
 0x298   : > { %1486 = vrot.lane.b32.xlu1 %v3082_v21, %s2076_s14 }
 0x299   : > { %v3089_v29 = vadd.f32 %v1427_v62, %v1407_v44 }
 0x29c   : > { %1490 = vrot.lane.b32.xlu1 %v3089_v29, %s2076_s14 }
 0x2c3   : > { %v1461_v19 = vpop.permute.xlu0 %1460 }
 0x2c4   : > { %v1508_v7 = vmul.f32 %v1461_v19, %v2715_v54 }
 0x2c6   : > { %v1902_v37 = vpack.c.bf16 %v1508_v7, %v1508_v7  ;;  %v1524_v48 = vsel %vm516_vm0, %v1508_v7, 0.0 }
 0x2c7   : > { %v1463_v34 = vpop.permute.xlu1 %1462 }
 0x2c8   : > { %v1509_v17 = vmul.f32 %v1463_v34, %v2736_v36  ;;  %1628 = vst.msk [vmem:[%s3098_s21] sm:$0xf] %vm1627_vm6, %v1902_v37 }
 0x2ca   : > { %v1903_v57 = vpack.c.bf16 %v1509_v17, %v1509_v17  ;;  %v1525_v36 = vsel %vm516_vm0, %v1509_v17, 0.0 }
 0x2cb   : > { %v1526_v15 = vadd.f32 %v1525_v36, %v1524_v48 }
 0x2cc   : > { %1629 = vst.msk [vmem:[%s3098_s21 + $0x4] sm:$0xf] %vm1627_vm6, %v1903_v57 }
 0x2d2   : > { %v1465_v54 = vpop.permute.xlu1 %1464 }
 0x2d3   : > { %v1510_v12 = vmul.f32 %v1465_v54, %v2807_v24 }
 0x2d5   : > { %v1904_v18 = vpack.c.bf16 %v1510_v12, %v1510_v12  ;;  %v1469_v8 = vpop.permute.xlu0 %1468  ;;  %v1527_v60 = vsel %vm516_vm0, %v1510_v12, 0.0 }
 0x2d6   : > { %v1512_v0 = vmul.f32 %v1469_v8, %v2835_v35  ;;  %v1528_v35 = vadd.f32 %v1527_v60, %v1526_v15 }
 0x2d7   : > { %1630 = vst.msk [vmem:[%s3098_s21 + $0x8] sm:$0xf] %vm1627_vm6, %v1904_v18 }
 0x2d8   : > { %v1906_v6 = vpack.c.bf16 %v1512_v0, %v1512_v0  ;;  %v1531_v53 = vsel %vm516_vm0, %v1512_v0, 0.0 }
 0x2da   : > { %1632 = vst.msk [vmem:[%s3098_s21 + $0x10] sm:$0xf] %vm1627_vm6, %v1906_v6 }
 0x2e2   : > { %v1467_v11 = vpop.permute.xlu1 %1466 }
 0x2e3   : > { %v1511_v24 = vmul.f32 %v1467_v11, %v2915_v51 }
 0x2e4   : > { %v1473_v5 = vpop.permute.xlu0 %1472 }
 0x2e5   : > { %v1514_v45 = vmul.f32 %v1473_v5, %v2920_v52  ;;  %v1529_v25 = vsel %vm516_vm0, %v1511_v24, 0.0  ;;  %v1905_v30 = vpack.c.bf16 %v1511_v24, %v1511_v24 }
 0x2e6   : > { %v1530_v33 = vadd.f32 %v1529_v25, %v1528_v35 }
 0x2e7   : > { %v1908_v31 = vpack.c.bf16 %v1514_v45, %v1514_v45  ;;  %1631 = vst.msk [vmem:[%s3098_s21 + $0xc] sm:$0xf] %vm1627_vm6, %v1905_v30  ;;  %v1535_v16 = vsel %vm516_vm0, %v1514_v45, 0.0 }
 0x2e8   : > { %v1532_v20 = vadd.f32 %v1531_v53, %v1530_v33 }
 0x2e9   : > { %v1471_v58 = vpop.permute.xlu1 %1470  ;;  %1634 = vst.msk [vmem:[%s3098_s21 + $0x18] sm:$0xf] %vm1627_vm6, %v1908_v31 }
 0x2ea   : > { %v1513_v51 = vmul.f32 %v1471_v58, %v2944_v13 }
 0x2ec   : > { %v1533_v40 = vsel %vm516_vm0, %v1513_v51, 0.0  ;;  %v1907_v52 = vpack.c.bf16 %v1513_v51, %v1513_v51 }
 0x2ed   : > { %v1475_v47 = vpop.permute.xlu1 %1474  ;;  %v1534_v46 = vadd.f32 %v1533_v40, %v1532_v20 }
 0x2ee   : > { %1633 = vst.msk [vmem:[%s3098_s21 + $0x14] sm:$0xf] %vm1627_vm6, %v1907_v52  ;;  %v1515_v1 = vmul.f32 %v1475_v47, %v2959_v22 }
 0x2ef   : > { %v1536_v26 = vadd.f32 %v1535_v16, %v1534_v46 }
 0x2f0   : > { %v1909_v32 = vpack.c.bf16 %v1515_v1, %v1515_v1  ;;  %v1537_v2 = vsel %vm516_vm0, %v1515_v1, 0.0 }
 0x2f1   : > { %v1477_v59 = vpop.permute.xlu0 %1476  ;;  %v1538_v38 = vadd.f32 %v1537_v2, %v1536_v26 }
 0x2f2   : > { %1635 = vst.msk [vmem:[%s3098_s21 + $0x1c] sm:$0xf] %vm1627_vm6, %v1909_v32  ;;  %v1516_v13 = vmul.f32 %v1477_v59, %v2983_v56 }
 0x2f4   : > { %v1910_v9 = vpack.c.bf16 %v1516_v13, %v1516_v13  ;;  %v1539_v61 = vsel %vm516_vm0, %v1516_v13, 0.0 }
 0x2f5   : > { %v1540_v50 = vadd.f32 %v1539_v61, %v1538_v38 }
 0x2f6   : > { %1636 = vst.msk [vmem:[%s3098_s21 + $0x20] sm:$0xf] %vm1627_vm6, %v1910_v9 }
 0x2f8   : > { %v1481_v23 = vpop.permute.xlu0 %1480 }
 0x2f9   : > { %v1518_v22 = vmul.f32 %v1481_v23, %v3010_v10 }
 0x2fb   : > { %v1912_v3 = vpack.c.bf16 %v1518_v22, %v1518_v22  ;;  %v1543_v10 = vsel %vm516_vm0, %v1518_v22, 0.0 }
 0x2fc   : > { %v1479_v41 = vpop.permute.xlu1 %1478 }
 0x2fd   : > { %v1517_v27 = vmul.f32 %v1479_v41, %v3028_v39  ;;  %1638 = vst.msk [vmem:[%s3098_s21 + $0x28] sm:$0xf] %vm1627_vm6, %v1912_v3 }
 0x2ff   : > { %v1541_v56 = vsel %vm516_vm0, %v1517_v27, 0.0  ;;  %v1911_v43 = vpack.c.bf16 %v1517_v27, %v1517_v27 }
 0x300   : > { %v1542_v28 = vadd.f32 %v1541_v56, %v1540_v50  ;;  %v1483_v63 = vpop.permute.xlu1 %1482 }
 0x301   : > { %1637 = vst.msk [vmem:[%s3098_s21 + $0x24] sm:$0xf] %vm1627_vm6, %v1911_v43  ;;  %v1519_v42 = vmul.f32 %v1483_v63, %v3051_v49 }
 0x302   : > { %v1544_v55 = vadd.f32 %v1543_v10, %v1542_v28 }
 0x303   : > { %v1545_v44 = vsel %vm516_vm0, %v1519_v42, 0.0  ;;  %v1913_v62 = vpack.c.bf16 %v1519_v42, %v1519_v42 }
 0x304   : > { %v1546_v39 = vadd.f32 %v1545_v44, %v1544_v55 }
 0x305   : > { %v1485_v19 = vpop.permute.xlu0 %1484  ;;  %1639 = vst.msk [vmem:[%s3098_s21 + $0x2c] sm:$0xf] %vm1627_vm6, %v1913_v62 }
 0x306   : > { %v1520_v7 = vmul.f32 %v1485_v19, %v3065_v14 }
 0x308   : > { %v1914_v37 = vpack.c.bf16 %v1520_v7, %v1520_v7  ;;  %v1547_v34 = vsel %vm516_vm0, %v1520_v7, 0.0 }
 0x309   : > { %v1489_v17 = vpop.permute.xlu0 %1488  ;;  %v1548_v57 = vadd.f32 %v1547_v34, %v1546_v39 }
 0x30a   : > { %1640 = vst.msk [vmem:[%s3098_s21 + $0x30] sm:$0xf] %vm1627_vm6, %v1914_v37  ;;  %v1487_v49 = vpop.permute.xlu1 %1486  ;;  %v1522_v54 = vmul.f32 %v1489_v17, %v3068_v4 }
 0x30b   : > { %v1521_v12 = vmul.f32 %v1487_v49, %v3082_v21 }
 0x30c   : > { %v1916_v18 = vpack.c.bf16 %v1522_v54, %v1522_v54  ;;  %v1551_v36 = vsel %vm516_vm0, %v1522_v54, 0.0 }
 0x30d   : > { %v1549_v14 = vsel %vm516_vm0, %v1521_v12, 0.0  ;;  %v1915_v8 = vpack.c.bf16 %v1521_v12, %v1521_v12 }
 0x30e   : > { %v1550_v0 = vadd.f32 %v1549_v14, %v1548_v57  ;;  %1642 = vst.msk [vmem:[%s3098_s21 + $0x38] sm:$0xf] %vm1627_vm6, %v1916_v18  ;;  %v1491_v6 = vpop.permute.xlu1 %1490 }
 0x30f   : > { %1641 = vst.msk [vmem:[%s3098_s21 + $0x34] sm:$0xf] %vm1627_vm6, %v1915_v8  ;;  %v1523_v48 = vmul.f32 %v1491_v6, %v3089_v29 }
 0x310   : > { %v1552_v4 = vadd.f32 %v1551_v36, %v1550_v0 }
 0x311   : > { %v1553_v60 = vsel %vm516_vm0, %v1523_v48, 0.0  ;;  %v1917_v21 = vpack.c.bf16 %v1523_v48, %v1523_v48 }
 0x312   : > { %v1554_v15 = vadd.f32 %v1553_v60, %v1552_v4 }
 0x313   : > { %1643 = vst.msk [vmem:[%s3098_s21 + $0x3c] sm:$0xf] %vm1627_vm6, %v1917_v21 }
 0x314   : > { %v1555_v11 = vrot.slane %v1554_v15, 4 }
 0x316   : > { %v1556_v24 = vadd.f32 %v1555_v11, %v1554_v15 }
 0x318   : > { %v1557_v5 = vrot.slane %v1556_v24, 2 }
 0x31a   : > { %v1558_v35 = vadd.f32 %v1557_v5, %v1556_v24 }
 0x31c   : > { %v1559_v45 = vrot.slane %v1558_v35, 1 }
 0x31e   : > { %v1560_v29 = vadd.f32 %v1559_v45, %v1558_v35 }
 0x320   : > { %1562 = vst.msk [vmem:[%s492_s25] sm:$0x1] %vm1561_vm7, %v1560_v29 }
 0x321 PF: > { %s19_s9 = sadd.s32 1, %s2074_s9   ;;  %s3241_s26 = sld [smem:[#allocation2_spill]] }
 0x322   : > { %p16_p13 = scmp.ge.s32.totalorder %s19_s9, 6   ;;  %s3242_s27 = smov %s2066_s29 }
 0x323   : > { %s3243_s28 = smov %s2070_s30  ;;  %s3244_s29 = smov %s3247_s10 }
 0x324   :  { %18 = sbr.rel (!%p16_p13) target bundleno = 3 (0x3), region = 96 }
 0x327   : > { %s3245_s30 = smov %s3241_s26 }

// kernel: naf_block.3
= control target key start
LH: loop header
LB: loop body
LE: loop exit
PB: predicated region body
PF: predicated region fallthrough
CT: control target
= control target key end

     0   :  { %s1759_s30 = smov 0   ;;  %s1761_s10 = smov 0   ;;  %s2151_s0 = inlined_call_operand.vmem [shape: f32[2,16,16,4], index: 0, kind: input, shape index: {}]   ;;  %s2152_s1 = inlined_call_operand.vmem [shape: bf16[2,16,16,4], index: 1, kind: input, shape index: {}]   ;;  %s2153_s2 = inlined_call_operand.vmem [shape: f32[2,1,4], index: 2, kind: input, shape index: {}]   ;;  %s2154_s3 = inlined_call_operand.vmem [shape: bf16[4,4], index: 3, kind: input, shape index: {}]   ;;  %s2155_s4 = inlined_call_operand.vmem [shape: f32[1,4], index: 4, kind: input, shape index: {}]   ;;  %s2156_s5 = inlined_call_operand.vmem [shape: bf16[4,8], index: 5, kind: input, shape index: {}]   ;;  %s2157_s6 = inlined_call_operand.vmem [shape: f32[1,8], index: 6, kind: input, shape index: {}]   ;;  %s2158_s7 = inlined_call_operand.vmem [shape: bf16[4,4], index: 7, kind: input, shape index: {}]   ;;  %s2159_s8 = inlined_call_operand.vmem [shape: f32[1,4], index: 8, kind: input, shape index: {}]   ;;  %s2160_s9 = inlined_call_operand.vmem [shape: f32[2,16,16,4], index: 9, kind: output, shape index: {}]  }
   0x1   :  { %s1763_s11 = smov 0   ;;  %s1765_s12 = smov 0  }
   0x2   :  { %s1767_s13 = smov 0  }
   0x3 LB: > { %s28_s14 = sadd.s32 1, %s1698_s11  ;;  %s31_s15 = sadd.s32 1, %s1702_s12  ;;  %s1706_s13 = sphi %s1767_s13, %s19_s13   ;;  %s1702_s12 = sphi %s1765_s12, %s2164_s12   ;;  %s1698_s11 = sphi %s1763_s11, %s2163_s11   ;;  %s1694_s10 = sphi %s1761_s10, %s2162_s10   ;;  %s1690_s30 = sphi %s1759_s30, %s2161_s30  }
   0x4   : > { %p29_p0 = scmp.ge.s32.totalorder %s28_s14, 2  ;;  %p1426_p1 = scmp.ge.s32.totalorder %s1706_s13, 1 }
   0x5   : > { %p335_p2 = scmp.lt.s32.totalorder %s1706_s13, 5 }
   0x6   : > { %s2166_s14 = smov (%p29_p0, %s28_s14), 0  ;;  %s2168_s15 = smov (!%p29_p0, %s31_s15), %s1702_s12 }
   0x7   : > { %p336_p3 = pnand %p1426_p1, %p335_p2  ;;  %p33_p4 = scmp.ge.s32.totalorder %s2168_s15, 2 }
   0x8   : > { %v510_v0 = vld [vmem:[%s2154_s3] sm:$0x3] (!%p336_p3)  ;;  %vm536_vm0 = vcmask (!%p336_p3), 1041408   ;;  %s1427_s18 = sshll.u32 (!%p336_p3), %s1690_s30, 3  ;;  %p395_p5 = scmp.lt.s32.totalorder (!%p336_p3), %s1694_s10, 1  ;;  %vm511_vm1 = vcmask (!%p336_p3), 31744  }
   0x9   : > { %s2170_s15 = smov (%p33_p4, %s2168_s15), 0  ;;  %339 = sbr.rel (%p336_p3) target bundleno = 1150 (0x47e), region = 56 }
   0xa   : > { %1591 = vmatprep.subr.msk.bf16.mxu0 (!%p336_p3), %vm536_vm0, %v510_v0  ;;  %v538_v1 = vsel (!%p336_p3), %vm536_vm0, %v510_v0, 0  ;;  %p397_p6 = scmp.lt.s32.totalorder (!%p336_p3), %s1427_s18, 15  ;;  %1592 = vmatprep.subr.msk.bf16.mxu1 (!%p336_p3), %vm536_vm0, %v510_v0  ;;  %v1825_v54 = vld [vmem:[%s2155_s4] ss:$0 sm:$0xff] (!%p336_p3)  ;;  %s1708_s26 = smov (!%p336_p3), 124  }
   0xb   : > { %1536 = vmatpush3.bf16.msra.mxu0 (!%p336_p3), %v538_v1  ;;  %1590 = vmatpush3.bf16.msra.mxu1 (!%p336_p3), %v538_v1 }
  0x10   : > { %s2172_s10 = smov (!%p395_p5, %s1694_s10), 1  ;;  %s2174_s18 = smov (!%p397_p6, %s1427_s18), 15 }
  0x11   : > { %s1429_s19 = sshll.u32 %s2172_s10, 5  ;;  %s1428_s20 = sshll.u32 %s2174_s18, 1 }
  0x12   : > { %s418_s23 = scalar_lea.vmem %s2153_s2, %s2172_s10  ;;  %s1798_s24 = sadd.s32 %s1429_s19, %s1428_s20 }
  0x13   : > { %s1434_s25 = sshll.u32 %s1798_s24, 2  ;;  %v1439_v2 = vld [vmem:[%s418_s23] ss:$0 sm:$0xff]  ;;  %s1430_s29 = sshll.u32 %s1798_s24, 3 }
  0x14   : > { %s414_s28 = scalar_lea.vmem %s2152_s1, %s1434_s25  ;;  %s1818_s16 = scalar_lea.vmem %s2151_s0, %s1430_s29 }
  0x15   : > { %v1470_v3 = vld [vmem:[%s414_s28] sm:$0xff]   ;;  %v1501_v4 = vld [vmem:[%s414_s28 + $0x8] sm:$0xff]   ;;  %v1502_v5 = vld [vmem:[%s414_s28 + $0x10] sm:$0xff]  }
  0x16   : > { %v1471_v6 = vunpack.c.l.bf16 %v1470_v3  ;;  %v1472_v7 = vunpack.c.h.bf16 %v1470_v3  ;;  %v1475_v8 = vunpack.c.l.bf16 %v1501_v4  ;;  %v1476_v9 = vunpack.c.h.bf16 %v1501_v4  ;;  %v1503_v10 = vld [vmem:[%s414_s28 + $0x18] sm:$0xff]   ;;  %v1504_v15 = vld [vmem:[%s414_s28 + $0x20] sm:$0xff]   ;;  %v1505_v20 = vld [vmem:[%s414_s28 + $0x28] sm:$0xff]  }
  0x17   : > { %v1479_v11 = vunpack.c.l.bf16 %v1502_v5  ;;  %v1480_v12 = vunpack.c.h.bf16 %v1502_v5  ;;  %v1483_v13 = vunpack.c.l.bf16 %v1503_v10  ;;  %v1484_v14 = vunpack.c.h.bf16 %v1503_v10  ;;  %v1506_v24 = vld [vmem:[%s414_s28 + $0x30] sm:$0xff]   ;;  %v1507_v29 = vld [vmem:[%s414_s28 + $0x38] sm:$0xff]   ;;  %v431_v52 = vld [vmem:[%s1818_s16] sm:$0xff] }
  0x18   : > { %v486_v16 = vmul.f32 %v1471_v6, %v1439_v2  ;;  %v487_v17 = vmul.f32 %v1472_v7, %v1439_v2  ;;  %v488_v18 = vmul.f32 %v1475_v8, %v1439_v2  ;;  %v489_v19 = vmul.f32 %v1476_v9, %v1439_v2  ;;  %v433_v51 = vld [vmem:[%s1818_s16 + $0x10] sm:$0xff]  ;;  %v434_v55 = vld [vmem:[%s1818_s16 + $0x18] sm:$0xff]  ;;  %v432_v58 = vld [vmem:[%s1818_s16 + $0x8] sm:$0xff] }
  0x19   : > { %v490_v21 = vmul.f32 %v1479_v11, %v1439_v2  ;;  %v491_v22 = vmul.f32 %v1480_v12, %v1439_v2  ;;  %v492_v23 = vmul.f32 %v1483_v13, %v1439_v2  ;;  %v1487_v27 = vunpack.c.l.bf16 %v1504_v15  ;;  %v441_v61 = vld [vmem:[%s1818_s16 + $0x50] sm:$0xff]  ;;  %v439_v1 = vld [vmem:[%s1818_s16 + $0x40] sm:$0xff]  ;;  %v442_v5 = vld [vmem:[%s1818_s16 + $0x58] sm:$0xff] }
  0x1a   : > { %v502_v25 = vpack.c.bf16 %v487_v17, %v486_v16  ;;  %v503_v26 = vpack.c.bf16 %v489_v19, %v488_v18  ;;  %v1488_v28 = vunpack.c.h.bf16 %v1504_v15  ;;  %v493_v31 = vmul.f32 %v1484_v14, %v1439_v2  ;;  %v440_v10 = vld [vmem:[%s1818_s16 + $0x48] sm:$0xff]  ;;  %v437_v13 = vld [vmem:[%s1818_s16 + $0x30] sm:$0xff]  ;;  %v435_v16 = vld [vmem:[%s1818_s16 + $0x20] sm:$0xff] }
  0x1b   : > { %v504_v30 = vpack.c.bf16 %v491_v22, %v490_v21  ;;  %v1491_v32 = vunpack.c.l.bf16 %v1505_v20  ;;  %v1492_v33 = vunpack.c.h.bf16 %v1505_v20  ;;  %v494_v34 = vmul.f32 %v1487_v27, %v1439_v2  ;;  %v438_v20 = vld [vmem:[%s1818_s16 + $0x38] sm:$0xff] }
  0x1c   : > { %1537 = vmatprep.mubr.msk.bf16.mxu0 %vm511_vm1, %v502_v25  ;;  %v495_v35 = vmul.f32 %v1488_v28, %v1439_v2  ;;  %v1495_v36 = vunpack.c.l.bf16 %v1506_v24  ;;  %v1496_v37 = vunpack.c.h.bf16 %v1506_v24  ;;  %v1499_v40 = vunpack.c.l.bf16 %v1507_v29  ;;  %v436_v25 = vld [vmem:[%s1818_s16 + $0x28] sm:$0xff] }
  0x1d   : > { %1538 = vmatmul.mubr.msk.bf16.vlgmr.msra.gmra.mrb[0].mxu0 %vm511_vm1, %v503_v26  ;;  %v496_v38 = vmul.f32 %v1491_v32, %v1439_v2  ;;  %v497_v39 = vmul.f32 %v1492_v33, %v1439_v2  ;;  %v1500_v41 = vunpack.c.h.bf16 %v1507_v29  ;;  %v505_v47 = vpack.c.bf16 %v493_v31, %v492_v23  ;;  %v445_v29 = vld [vmem:[%s1818_s16 + $0x70] sm:$0xff]  ;;  %v443_v32 = vld [vmem:[%s1818_s16 + $0x60] sm:$0xff] }
  0x1e   : > { %1541 = vmatprep.mubr.msk.bf16.mxu0 %vm511_vm1, %v504_v30  ;;  %v506_v42 = vpack.c.bf16 %v495_v35, %v494_v34  ;;  %v498_v43 = vmul.f32 %v1495_v36, %v1439_v2  ;;  %v499_v44 = vmul.f32 %v1496_v37, %v1439_v2  ;;  %v500_v48 = vmul.f32 %v1499_v40, %v1439_v2  ;;  %v446_v36 = vld [vmem:[%s1818_s16 + $0x78] sm:$0xff] }
  0x1f   : > { %v507_v45 = vpack.c.bf16 %v497_v39, %v496_v38  ;;  %v501_v49 = vmul.f32 %v1500_v41, %v1439_v2  ;;  %v444_v39 = vld [vmem:[%s1818_s16 + $0x68] sm:$0xff]  ;;  %s2087_s16 = scalar_lea.vmem %s2160_s9, %s1430_s29 }
  0x20   : > { %1545 = vmatprep.mubr.msk.bf16.mxu1 %vm511_vm1, %v506_v42  ;;  %v508_v46 = vpack.c.bf16 %v499_v44, %v498_v43 }
  0x21   : > { %1546 = vmatmul.mubr.msk.bf16.vlgmr.msra.gmra.mrb[0].mxu1 %vm511_vm1, %v507_v45  ;;  %v509_v50 = vpack.c.bf16 %v501_v49, %v500_v48 }
  0x22   : > { %1549 = vmatprep.mubr.msk.bf16.mxu1 %vm511_vm1, %v508_v46 }
  0x25   : > { %1542 = vmatmul.mubr.msk.bf16.gmra.mrb[4].mxu0 %vm511_vm1, %v505_v47 }
  0x29   : > { %1550 = vmatmul.mubr.msk.bf16.gmra.mrb[4].mxu1 %vm511_vm1, %v509_v50 }
  0xf0   : > { %v1539_v53 = vpop.f32.mrb[0].mxu0 }
  0xf1   : > { %v639_v56 = vadd.f32 %v1539_v53, %v433_v51  ;;  %v574_v57 = vpop.f32.mrb[1].mxu0 }
  0xf2   : > { %v637_v59 = vadd.f32 %v574_v57, %v431_v52  ;;  %v1540_v60 = vpop.f32.mrb[2].mxu0 }
  0xf3   : > { %v1831_v62 = vadd.f32 %v1825_v54, %v639_v56  ;;  %v640_v63 = vadd.f32 %v1540_v60, %v434_v55  ;;  %v577_v0 = vpop.f32.mrb[3].mxu0 }
  0xf4   : > { %v1835_v2 = vadd.f32 %v1825_v54, %v637_v59  ;;  %v638_v3 = vadd.f32 %v577_v0, %v432_v58  ;;  %v1547_v4 = vpop.f32.mrb[0].mxu1 }
  0xf5   : > { %v1839_v6 = vadd.f32 %v1825_v54, %v640_v63  ;;  %v682_v7 = vsel %vm511_vm1, %v1831_v62, 0.0  ;;  %v647_v8 = vadd.f32 %v1547_v4, %v441_v61  ;;  %v606_v9 = vpop.f32.mrb[1].mxu1 }
  0xf6   : > { %v1845_v11 = vadd.f32 %v1825_v54, %v638_v3  ;;  %683 = vadd.xlane.f32.xlu1 %v682_v7  ;;  %v676_v12 = vsel %vm511_vm1, %v1835_v2, 0.0  ;;  %v645_v14 = vadd.f32 %v606_v9, %v439_v1  ;;  %v1548_v15 = vpop.f32.mrb[2].mxu1 }
  0xf7   : > { %677 = vadd.xlane.f32.xlu0 %v676_v12  ;;  %v648_v17 = vadd.f32 %v1548_v15, %v442_v5  ;;  %v609_v18 = vpop.f32.mrb[3].mxu1  ;;  %v685_v24 = vsel %vm511_vm1, %v1839_v6, 0.0  ;;  %v1890_v56 = vadd.f32 %v1825_v54, %v647_v8 }
  0xf8   : > { %v1543_v19 = vpop.f32.mrb[4].mxu0  ;;  %v646_v21 = vadd.f32 %v609_v18, %v440_v10  ;;  %v679_v28 = vsel %vm511_vm1, %v1845_v11, 0.0  ;;  %v1876_v48 = vadd.f32 %v1825_v54, %v645_v14 }
  0xf9   : > { %v643_v22 = vadd.f32 %v1543_v19, %v437_v13  ;;  %v590_v23 = vpop.f32.mrb[5].mxu0  ;;  %v1895_v58 = vadd.f32 %v1825_v54, %v648_v17  ;;  %v706_v61 = vsel %vm511_vm1, %v1890_v56, 0.0 }
  0xfa   : > { %v641_v26 = vadd.f32 %v590_v23, %v435_v16  ;;  %v1544_v27 = vpop.f32.mrb[6].mxu0  ;;  %686 = vadd.xlane.f32.xlu1 %v685_v24  ;;  %v1881_v51 = vadd.f32 %v1825_v54, %v646_v21  ;;  %v700_v55 = vsel %vm511_vm1, %v1876_v48, 0.0 }
  0xfb   : > { %v644_v30 = vadd.f32 %v1544_v27, %v438_v20  ;;  %v593_v31 = vpop.f32.mrb[7].mxu0  ;;  %680 = vadd.xlane.f32.xlu0 %v679_v28  ;;  %v1865_v40 = vadd.f32 %v1825_v54, %v643_v22  ;;  %v709_v63 = vsel %vm511_vm1, %v1895_v58, 0.0 }
  0xfc   : > { %v1860_v33 = vadd.f32 %v1825_v54, %v641_v26  ;;  %v642_v34 = vadd.f32 %v593_v31, %v436_v25  ;;  %v1551_v35 = vpop.f32.mrb[4].mxu1  ;;  %v703_v57 = vsel %vm511_vm1, %v1881_v51, 0.0 }
  0xfd   : > { %v651_v37 = vadd.f32 %v1551_v35, %v445_v29  ;;  %v622_v38 = vpop.f32.mrb[5].mxu1  ;;  %v1873_v47 = vadd.f32 %v1825_v54, %v644_v30  ;;  %v694_v52 = vsel %vm511_vm1, %v1865_v40, 0.0 }
  0xfe   : > { %v1868_v41 = vadd.f32 %v1825_v54, %v642_v34  ;;  %v688_v42 = vsel %vm511_vm1, %v1860_v33, 0.0  ;;  %v649_v43 = vadd.f32 %v622_v38, %v443_v32  ;;  %v1552_v44 = vpop.f32.mrb[6].mxu1 }
  0xff   : > { %689 = vadd.xlane.f32.xlu0 %v688_v42  ;;  %v652_v45 = vadd.f32 %v1552_v44, %v446_v36  ;;  %v625_v46 = vpop.f32.mrb[7].mxu1  ;;  %v697_v53 = vsel %vm511_vm1, %v1873_v47, 0.0  ;;  %v1910_v1 = vadd.f32 %v1825_v54, %v651_v37 }
 0x100   : > { %v691_v49 = vsel %vm511_vm1, %v1868_v41, 0.0  ;;  %v650_v50 = vadd.f32 %v625_v46, %v444_v39  ;;  %v1898_v59 = vadd.f32 %v1825_v54, %v649_v43 }
 0x101   : > { %692 = vadd.xlane.f32.xlu1 %v691_v49  ;;  %v1915_v4 = vadd.f32 %v1825_v54, %v652_v45  ;;  %v718_v5 = vsel %vm511_vm1, %v1910_v1, 0.0 }
 0x102   : > { %v1901_v60 = vadd.f32 %v1825_v54, %v650_v50  ;;  %v712_v0 = vsel %vm511_vm1, %v1898_v59, 0.0 }
 0x103   : > { %695 = vadd.xlane.f32.xlu0 %v694_v52  ;;  %v721_v7 = vsel %vm511_vm1, %v1915_v4, 0.0 }
 0x104   : > { %v715_v3 = vsel %vm511_vm1, %v1901_v60, 0.0 }
 0x105   : > { %698 = vadd.xlane.f32.xlu1 %v697_v53 }
 0x107   : > { %701 = vadd.xlane.f32.xlu0 %v700_v55 }
 0x109   : > { %704 = vadd.xlane.f32.xlu1 %v703_v57 }
 0x10b   : > { %707 = vadd.xlane.f32.xlu0 %v706_v61 }
 0x10d   : > { %710 = vadd.xlane.f32.xlu1 %v709_v63 }
 0x10f   : > { %713 = vadd.xlane.f32.xlu0 %v712_v0 }
 0x111   : > { %716 = vadd.xlane.f32.xlu1 %v715_v3 }
 0x113   : > { %719 = vadd.xlane.f32.xlu0 %v718_v5 }
 0x115   : > { %722 = vadd.xlane.f32.xlu1 %v721_v7 }
 0x183   : > { %v684_v8 = vpop.xlane.xlu1 %683 }
 0x184   : > { %v727_v9 = vmul.f32 0.25, %v684_v8  ;;  %v678_v10 = vpop.xlane.xlu0 %677 }
 0x185   : > { %v725_v12 = vmul.f32 0.25, %v678_v10 }
 0x186   : > { %v1922_v13 = vsub.f32 %v1831_v62, %v727_v9 }
 0x187   : > { %v1925_v14 = vsub.f32 %v1835_v2, %v725_v12  ;;  %v687_v54 = vpop.xlane.xlu1 %686 }
 0x188   : > { %v728_v15 = vmul.f32 0.25, %v687_v54  ;;  %v681_v16 = vpop.xlane.xlu0 %680  ;;  %v759_v22 = vmul.f32 %v1922_v13, %v1922_v13 }
 0x189   : > { %v726_v17 = vmul.f32 0.25, %v681_v16  ;;  %v757_v18 = vmul.f32 %v1925_v14, %v1925_v14 }
 0x18a   : > { %v1930_v19 = vsub.f32 %v1839_v6, %v728_v15  ;;  %v779_v30 = vsel %vm511_vm1, %v759_v22, 0.0 }
 0x18b   : > { %v1933_v20 = vsub.f32 %v1845_v11, %v726_v17  ;;  %v773_v21 = vsel %vm511_vm1, %v757_v18, 0.0 }
 0x18c   : > { %774 = vadd.xlane.f32.xlu0 %v773_v21  ;;  %v690_v23 = vpop.xlane.xlu0 %689  ;;  %v760_v27 = vmul.f32 %v1930_v19, %v1930_v19 }
 0x18d   : > { %v729_v24 = vmul.f32 0.25, %v690_v23  ;;  %v758_v25 = vmul.f32 %v1933_v20, %v1933_v20 }
 0x18e   : > { %v693_v26 = vpop.xlane.xlu1 %692  ;;  %v782_v38 = vsel %vm511_vm1, %v760_v27, 0.0 }
 0x18f   : > { %v1943_v28 = vsub.f32 %v1860_v33, %v729_v24  ;;  %v730_v29 = vmul.f32 0.25, %v693_v26  ;;  %v776_v31 = vsel %vm511_vm1, %v758_v25, 0.0 }
 0x190   : > { %780 = vadd.xlane.f32.xlu0 %v779_v30  ;;  %777 = vadd.xlane.f32.xlu1 %v776_v31  ;;  %v696_v32 = vpop.xlane.xlu0 %695 }
 0x191   : > { %v1948_v34 = vsub.f32 %v1868_v41, %v730_v29  ;;  %v731_v35 = vmul.f32 0.25, %v696_v32  ;;  %v761_v36 = vmul.f32 %v1943_v28, %v1943_v28 }
 0x192   : > { %v699_v37 = vpop.xlane.xlu1 %698 }
 0x193   : > { %v1954_v39 = vsub.f32 %v1865_v40, %v731_v35  ;;  %v732_v42 = vmul.f32 0.25, %v699_v37  ;;  %v785_v43 = vsel %vm511_vm1, %v761_v36, 0.0  ;;  %v762_v44 = vmul.f32 %v1948_v34, %v1948_v34 }
 0x194   : > { %783 = vadd.xlane.f32.xlu1 %v782_v38  ;;  %786 = vadd.xlane.f32.xlu0 %v785_v43  ;;  %v702_v45 = vpop.xlane.xlu0 %701 }
 0x195   : > { %v1960_v46 = vsub.f32 %v1873_v47, %v732_v42  ;;  %v733_v49 = vmul.f32 0.25, %v702_v45  ;;  %v763_v50 = vmul.f32 %v1954_v39, %v1954_v39  ;;  %v788_v53 = vsel %vm511_vm1, %v762_v44, 0.0 }
 0x196   : > { %v705_v52 = vpop.xlane.xlu1 %704 }
 0x197   : > { %v1966_v55 = vsub.f32 %v1876_v48, %v733_v49  ;;  %v734_v57 = vmul.f32 0.25, %v705_v52  ;;  %v791_v61 = vsel %vm511_vm1, %v763_v50, 0.0  ;;  %v764_v63 = vmul.f32 %v1960_v46, %v1960_v46 }
 0x198   : > { %789 = vadd.xlane.f32.xlu1 %v788_v53  ;;  %792 = vadd.xlane.f32.xlu0 %v791_v61  ;;  %v708_v0 = vpop.xlane.xlu0 %707 }
 0x199   : > { %v1972_v3 = vsub.f32 %v1881_v51, %v734_v57  ;;  %v735_v5 = vmul.f32 0.25, %v708_v0  ;;  %v765_v7 = vmul.f32 %v1966_v55, %v1966_v55  ;;  %v794_v9 = vsel %vm511_vm1, %v764_v63, 0.0  ;;  %v893_v57 = vld [vmem:[%s2156_s5] sm:$0x3] }
 0x19a   : > { %v711_v8 = vpop.xlane.xlu1 %710  ;;  %1593 = vmatprep.subr.msk.bf16.mxu1 %vm536_vm0, %v893_v57  ;;  %v926_v61 = vsel %vm536_vm0, %v893_v57, 0 }
 0x19b   : > { %v1978_v10 = vsub.f32 %v1890_v56, %v735_v5  ;;  %v736_v12 = vmul.f32 0.25, %v711_v8  ;;  %v797_v54 = vsel %vm511_vm1, %v765_v7, 0.0  ;;  %v766_v15 = vmul.f32 %v1972_v3, %v1972_v3  ;;  %1554 = vmatpush3.bf16.msra.mxu1 %v926_v61 }
 0x19c   : > { %795 = vadd.xlane.f32.xlu1 %v794_v9  ;;  %798 = vadd.xlane.f32.xlu0 %v797_v54  ;;  %v714_v16 = vpop.xlane.xlu0 %713 }
 0x19d   : > { %v1984_v17 = vsub.f32 %v1895_v58, %v736_v12  ;;  %v737_v18 = vmul.f32 0.25, %v714_v16  ;;  %v767_v21 = vmul.f32 %v1978_v10, %v1978_v10  ;;  %v800_v23 = vsel %vm511_vm1, %v766_v15, 0.0 }
 0x19e   : > { %v717_v22 = vpop.xlane.xlu1 %716 }
 0x19f   : > { %v1990_v24 = vsub.f32 %v1898_v59, %v737_v18  ;;  %v738_v25 = vmul.f32 0.25, %v717_v22  ;;  %v803_v26 = vsel %vm511_vm1, %v767_v21, 0.0  ;;  %v768_v27 = vmul.f32 %v1984_v17, %v1984_v17 }
 0x1a0   : > { %801 = vadd.xlane.f32.xlu1 %v800_v23  ;;  %804 = vadd.xlane.f32.xlu0 %v803_v26  ;;  %v720_v29 = vpop.xlane.xlu0 %719 }
 0x1a1   : > { %v1996_v30 = vsub.f32 %v1901_v60, %v738_v25  ;;  %v739_v31 = vmul.f32 0.25, %v720_v29  ;;  %v769_v32 = vmul.f32 %v1990_v24, %v1990_v24  ;;  %v806_v36 = vsel %vm511_vm1, %v768_v27, 0.0 }
 0x1a2   : > { %v723_v35 = vpop.xlane.xlu1 %722 }
 0x1a3   : > { %v2002_v37 = vsub.f32 %v1910_v1, %v739_v31  ;;  %v740_v38 = vmul.f32 0.25, %v723_v35  ;;  %v809_v42 = vsel %vm511_vm1, %v769_v32, 0.0  ;;  %v770_v43 = vmul.f32 %v1996_v30, %v1996_v30 }
 0x1a4   : > { %807 = vadd.xlane.f32.xlu1 %v806_v36  ;;  %810 = vadd.xlane.f32.xlu0 %v809_v42 }
 0x1a5   : > { %v2008_v44 = vsub.f32 %v1915_v4, %v740_v38  ;;  %v771_v45 = vmul.f32 %v2002_v37, %v2002_v37  ;;  %v812_v49 = vsel %vm511_vm1, %v770_v43, 0.0 }
 0x1a7   : > { %v815_v50 = vsel %vm511_vm1, %v771_v45, 0.0  ;;  %v772_v52 = vmul.f32 %v2008_v44, %v2008_v44 }
 0x1a8   : > { %813 = vadd.xlane.f32.xlu1 %v812_v49  ;;  %816 = vadd.xlane.f32.xlu0 %v815_v50 }
 0x1a9   : > { %v818_v53 = vsel %vm511_vm1, %v772_v52, 0.0 }
 0x1ac   : > { %819 = vadd.xlane.f32.xlu1 %v818_v53 }
 0x219   : > { %v775_v63 = vpop.xlane.xlu0 %774 }
 0x21a   : > { %v821_v0 = vmul.f32 0.25, %v775_v63 }
 0x21c   : > { %v837_v5 = vadd.f32 1e-06, %v821_v0 }
 0x21d   : > { %v778_v7 = vpop.xlane.xlu1 %777  ;;  %v781_v8 = vpop.xlane.xlu0 %780 }
 0x21e   : > { %v822_v9 = vmul.f32 0.25, %v778_v7  ;;  %v823_v12 = vmul.f32 0.25, %v781_v8  ;;  %1636 = vrsqrt.f32 %v837_v5 }
 0x220   : > { %v838_v54 = vadd.f32 1e-06, %v822_v9  ;;  %v839_v15 = vadd.f32 1e-06, %v823_v12 }
 0x221   : > { %v784_v16 = vpop.xlane.xlu1 %783  ;;  %v787_v18 = vpop.xlane.xlu0 %786 }
 0x222   : > { %1638 = vrsqrt.f32 %v838_v54  ;;  %v824_v21 = vmul.f32 0.25, %v784_v16  ;;  %v825_v22 = vmul.f32 0.25, %v787_v18 }
 0x223   : > { %1640 = vrsqrt.f32 %v839_v15 }
 0x224   : > { %v840_v23 = vadd.f32 1e-06, %v824_v21  ;;  %v841_v25 = vadd.f32 1e-06, %v825_v22 }
 0x225   : > { %v790_v26 = vpop.xlane.xlu1 %789  ;;  %v793_v27 = vpop.xlane.xlu0 %792 }
 0x226   : > { %1642 = vrsqrt.f32 %v840_v23  ;;  %v826_v29 = vmul.f32 0.25, %v790_v26  ;;  %v827_v31 = vmul.f32 0.25, %v793_v27 }
 0x227   : > { %1644 = vrsqrt.f32 %v841_v25 }
 0x228   : > { %v842_v32 = vadd.f32 1e-06, %v826_v29  ;;  %v843_v35 = vadd.f32 1e-06, %v827_v31  ;;  %v1637_v42 = vpop.eup %1636 }
 0x229   : > { %v796_v36 = vpop.xlane.xlu1 %795  ;;  %v799_v38 = vpop.xlane.xlu0 %798  ;;  %v869_v61 = vmul.f32 %v1637_v42, %v1925_v14 }
 0x22a   : > { %1646 = vrsqrt.f32 %v842_v32  ;;  %v828_v43 = vmul.f32 0.25, %v796_v36  ;;  %v829_v45 = vmul.f32 0.25, %v799_v38 }
 0x22b   : > { %1648 = vrsqrt.f32 %v843_v35 }
 0x22c   : > { %v1639_v49 = vpop.eup %1638  ;;  %v844_v50 = vadd.f32 1e-06, %v828_v43  ;;  %v845_v52 = vadd.f32 1e-06, %v829_v45 }
 0x22d   : > { %v802_v53 = vpop.xlane.xlu1 %801  ;;  %v805_v57 = vpop.xlane.xlu0 %804  ;;  %v870_v63 = vmul.f32 %v1639_v49, %v1933_v20 }
 0x22e   : > { %v1641_v0 = vpop.eup %1640  ;;  %1650 = vrsqrt.f32 %v844_v50  ;;  %v830_v5 = vmul.f32 0.25, %v802_v53  ;;  %v831_v7 = vmul.f32 0.25, %v805_v57 }
 0x22f   : > { %v885_v8 = vpack.c.bf16 %v870_v63, %v869_v61  ;;  %1652 = vrsqrt.f32 %v845_v52  ;;  %v871_v15 = vmul.f32 %v1641_v0, %v1922_v13 }
 0x230   : > { %v1643_v9 = vpop.eup %1642  ;;  %v846_v12 = vadd.f32 1e-06, %v830_v5  ;;  %v847_v54 = vadd.f32 1e-06, %v831_v7 }
 0x231   : > { %v872_v16 = vmul.f32 %v1643_v9, %v1930_v19  ;;  %v808_v18 = vpop.xlane.xlu1 %807  ;;  %1555 = vmatprep.mubr.msk.bf16.mxu1 %vm511_vm1, %v885_v8  ;;  %v811_v21 = vpop.xlane.xlu0 %810 }
 0x232   : > { %v1645_v14 = vpop.eup %1644  ;;  %1654 = vrsqrt.f32 %v846_v12  ;;  %v832_v20 = vmul.f32 0.25, %v808_v18  ;;  %v833_v22 = vmul.f32 0.25, %v811_v21 }
 0x233   : > { %v886_v23 = vpack.c.bf16 %v872_v16, %v871_v15  ;;  %1656 = vrsqrt.f32 %v847_v54  ;;  %v873_v13 = vmul.f32 %v1645_v14, %v1943_v28 }
 0x234   : > { %v1647_v25 = vpop.eup %1646  ;;  %v848_v26 = vadd.f32 1e-06, %v832_v20  ;;  %v849_v27 = vadd.f32 1e-06, %v833_v22 }
 0x235   : > { %v814_v29 = vpop.xlane.xlu1 %813  ;;  %1556 = vmatmul.mubr.msk.bf16.vlgmr.msra.gmra.mrb[8].mxu1 %vm511_vm1, %v886_v23  ;;  %v817_v31 = vpop.xlane.xlu0 %816  ;;  %v874_v19 = vmul.f32 %v1647_v25, %v1948_v34 }
 0x236   : > { %v1649_v32 = vpop.eup %1648  ;;  %1658 = vrsqrt.f32 %v848_v26  ;;  %v834_v35 = vmul.f32 0.25, %v814_v29  ;;  %v835_v36 = vmul.f32 0.25, %v817_v31 }
 0x237   : > { %v887_v38 = vpack.c.bf16 %v874_v19, %v873_v13  ;;  %1660 = vrsqrt.f32 %v849_v27  ;;  %v875_v50 = vmul.f32 %v1649_v32, %v1954_v39 }
 0x238   : > { %v1651_v42 = vpop.eup %1650  ;;  %v850_v43 = vadd.f32 1e-06, %v834_v35  ;;  %v851_v45 = vadd.f32 1e-06, %v835_v36 }
 0x239   : > { %v820_v49 = vpop.xlane.xlu1 %819  ;;  %1559 = vmatprep.mubr.msk.bf16.mxu1 %vm511_vm1, %v887_v38  ;;  %v876_v52 = vmul.f32 %v1651_v42, %v1960_v46  ;;  %v1653_v53 = vpop.eup %1652 }
 0x23a   : > { %1662 = vrsqrt.f32 %v850_v43  ;;  %v836_v28 = vmul.f32 0.25, %v820_v49  ;;  %v877_v63 = vmul.f32 %v1653_v53, %v1966_v55 }
 0x23b   : > { %v888_v34 = vpack.c.bf16 %v876_v52, %v875_v50  ;;  %1664 = vrsqrt.f32 %v851_v45 }
 0x23c   : > { %v1655_v57 = vpop.eup %1654  ;;  %v852_v61 = vadd.f32 1e-06, %v836_v28 }
 0x23d   : > { %1560 = vmatmul.mubr.msk.bf16.gmra.mrb[12].mxu1 %vm511_vm1, %v888_v34  ;;  %v878_v0 = vmul.f32 %v1655_v57, %v1972_v3  ;;  %v1657_v5 = vpop.eup %1656 }
 0x23e   : > { %1666 = vrsqrt.f32 %v852_v61  ;;  %v879_v39 = vmul.f32 %v1657_v5, %v1978_v10 }
 0x23f   : > { %v889_v7 = vpack.c.bf16 %v878_v0, %v877_v63 }
 0x240   : > { %v1659_v8 = vpop.eup %1658 }
 0x241   : > { %1563 = vmatprep.mubr.msk.bf16.mxu1 %vm511_vm1, %v889_v7  ;;  %v880_v46 = vmul.f32 %v1659_v8, %v1984_v17  ;;  %v1661_v9 = vpop.eup %1660  ;;  %v1113_v17 = vld [vmem:[%s2158_s7] sm:$0x3] }
 0x242   : > { %v881_v15 = vmul.f32 %v1661_v9, %v1990_v24  ;;  %1594 = vmatprep.subr.msk.bf16.mxu0 %vm536_vm0, %v1113_v17  ;;  %v1139_v24 = vsel %vm536_vm0, %v1113_v17, 0 }
 0x243   : > { %v890_v12 = vpack.c.bf16 %v880_v46, %v879_v39  ;;  %1572 = vmatpush3.bf16.msra.mxu0 %v1139_v24 }
 0x244   : > { %v1663_v54 = vpop.eup %1662 }
 0x245   : > { %1564 = vmatmul.mubr.msk.bf16.gmra.mrb[16].mxu1 %vm511_vm1, %v890_v12  ;;  %v882_v55 = vmul.f32 %v1663_v54, %v1996_v30  ;;  %v1665_v3 = vpop.eup %1664  ;;  %v1449_v30 = vld [vmem:[%s2157_s6] ss:$0 sm:$0xff] }
 0x246   : > { %v883_v21 = vmul.f32 %v1665_v3, %v2002_v37 }
 0x247   : > { %v891_v16 = vpack.c.bf16 %v882_v55, %v881_v15 }
 0x248   : > { %v1667_v18 = vpop.eup %1666 }
 0x249   : > { %1567 = vmatprep.mubr.msk.bf16.mxu1 %vm511_vm1, %v891_v16  ;;  %v884_v10 = vmul.f32 %v1667_v18, %v2008_v44 }
 0x24b   : > { %v892_v14 = vpack.c.bf16 %v884_v10, %v883_v21 }
 0x24d   : > { %1568 = vmatmul.mubr.msk.bf16.gmra.mrb[20].mxu1 %vm511_vm1, %v892_v14 }
 0x308   : > { %v1557_v20 = vpop.f32.mrb[8].mxu1 }
 0x309   : > { %v971_v37 = vadd.f32 %v1557_v20, %v1449_v30  ;;  %v962_v22 = vpop.f32.mrb[9].mxu1 }
 0x30a   : > { %v963_v44 = vadd.f32 %v1449_v30, %v962_v22  ;;  %v1558_v23 = vpop.f32.mrb[10].mxu1 }
 0x30b   : > { %1045 = vrot.lane.b32.xlu1 %v971_v37, %s1708_s26  ;;  %v965_v25 = vpop.f32.mrb[11].mxu1  ;;  %v974_v29 = vadd.f32 %v1558_v23, %v1449_v30 }
 0x30c   : > { %v966_v26 = vadd.f32 %v1449_v30, %v965_v25  ;;  %1041 = vrot.lane.b32.xlu0 %v963_v44, %s1708_s26 }
 0x30f   : > { %1043 = vrot.lane.b32.xlu1 %v966_v26, %s1708_s26 }
 0x310   : > { %v1561_v27 = vpop.f32.mrb[12].mxu1 }
 0x311   : > { %v978_v31 = vpop.f32.mrb[13].mxu1  ;;  %v987_v36 = vadd.f32 %v1561_v27, %v1449_v30 }
 0x312   : > { %v979_v13 = vadd.f32 %v1449_v30, %v978_v31  ;;  %v1562_v19 = vpop.f32.mrb[14].mxu1 }
 0x313   : > { %1047 = vrot.lane.b32.xlu1 %v974_v29, %s1708_s26  ;;  %v981_v32 = vpop.f32.mrb[15].mxu1  ;;  %v990_v42 = vadd.f32 %v1562_v19, %v1449_v30 }
 0x314   : > { %v982_v35 = vadd.f32 %v1449_v30, %v981_v32  ;;  %1049 = vrot.lane.b32.xlu0 %v979_v13, %s1708_s26 }
 0x317   : > { %1051 = vrot.lane.b32.xlu1 %v982_v35, %s1708_s26 }
 0x318   : > { %1053 = vrot.lane.b32.xlu0 %v987_v36, %s1708_s26  ;;  %v1565_v38 = vpop.f32.mrb[16].mxu1 }
 0x319   : > { %v994_v43 = vpop.f32.mrb[17].mxu1  ;;  %v1003_v53 = vadd.f32 %v1565_v38, %v1449_v30 }
 0x31a   : > { %v995_v45 = vadd.f32 %v1449_v30, %v994_v43  ;;  %v1566_v49 = vpop.f32.mrb[18].mxu1 }
 0x31b   : > { %1055 = vrot.lane.b32.xlu1 %v990_v42, %s1708_s26  ;;  %v997_v50 = vpop.f32.mrb[19].mxu1  ;;  %v1006_v34 = vadd.f32 %v1566_v49, %v1449_v30 }
 0x31c   : > { %v998_v52 = vadd.f32 %v1449_v30, %v997_v50  ;;  %1057 = vrot.lane.b32.xlu0 %v995_v45, %s1708_s26 }
 0x31f   : > { %1059 = vrot.lane.b32.xlu1 %v998_v52, %s1708_s26 }
 0x320   : > { %1061 = vrot.lane.b32.xlu0 %v1003_v53, %s1708_s26  ;;  %v1569_v28 = vpop.f32.mrb[20].mxu1 }
 0x321   : > { %v1010_v57 = vpop.f32.mrb[21].mxu1  ;;  %v1019_v7 = vadd.f32 %v1569_v28, %v1449_v30 }
 0x322   : > { %v1011_v61 = vadd.f32 %v1449_v30, %v1010_v57  ;;  %v1570_v63 = vpop.f32.mrb[22].mxu1 }
 0x323   : > { %1063 = vrot.lane.b32.xlu1 %v1006_v34, %s1708_s26  ;;  %v1013_v0 = vpop.f32.mrb[23].mxu1  ;;  %v1022_v8 = vadd.f32 %v1570_v63, %v1449_v30 }
 0x324   : > { %v1014_v5 = vadd.f32 %v1449_v30, %v1013_v0  ;;  %1065 = vrot.lane.b32.xlu0 %v1011_v61, %s1708_s26 }
 0x327   : > { %1067 = vrot.lane.b32.xlu1 %v1014_v5, %s1708_s26 }
 0x328   : > { %1069 = vrot.lane.b32.xlu0 %v1019_v7, %s1708_s26 }
 0x32b   : > { %1071 = vrot.lane.b32.xlu1 %v1022_v8, %s1708_s26 }
 0x37d   : > { %v1046_v39 = vpop.permute.xlu1 %1045 }
 0x37e   : > { %v1042_v46 = vpop.permute.xlu0 %1041  ;;  %v1091_v3 = vmul.f32 %v1046_v39, %v971_v37 }
 0x37f   : > { %v1089_v12 = vmul.f32 %v1042_v46, %v963_v44 }
 0x381   : > { %v1044_v9 = vpop.permute.xlu1 %1043 }
 0x382   : > { %v1090_v54 = vmul.f32 %v1044_v9, %v966_v26 }
 0x384   : > { %v1105_v15 = vpack.c.bf16 %v1090_v54, %v1089_v12 }
 0x385   : > { %v1048_v55 = vpop.permute.xlu1 %1047 }
 0x386   : > { %v1092_v16 = vmul.f32 %v1048_v55, %v974_v29  ;;  %1573 = vmatprep.mubr.msk.bf16.mxu0 %vm511_vm1, %v1105_v15  ;;  %v1050_v18 = vpop.permute.xlu0 %1049 }
 0x387   : > { %v1093_v14 = vmul.f32 %v1050_v18, %v979_v13 }
 0x388   : > { %v1106_v21 = vpack.c.bf16 %v1092_v16, %v1091_v3 }
 0x389   : > { %v1052_v10 = vpop.permute.xlu1 %1051 }
 0x38a   : > { %v1094_v17 = vmul.f32 %v1052_v10, %v982_v35  ;;  %1574 = vmatmul.mubr.msk.bf16.vlgmr.msra.gmra.mrb[8].mxu0 %vm511_vm1, %v1106_v21  ;;  %v1054_v24 = vpop.permute.xlu0 %1053 }
 0x38b   : > { %v1095_v22 = vmul.f32 %v1054_v24, %v987_v36 }
 0x38c   : > { %v1107_v30 = vpack.c.bf16 %v1094_v17, %v1093_v14 }
 0x38d   : > { %v1056_v20 = vpop.permute.xlu1 %1055 }
 0x38e   : > { %v1096_v23 = vmul.f32 %v1056_v20, %v990_v42  ;;  %1577 = vmatprep.mubr.msk.bf16.mxu0 %vm511_vm1, %v1107_v30  ;;  %v1058_v44 = vpop.permute.xlu0 %1057 }
 0x38f   : > { %v1097_v26 = vmul.f32 %v1058_v44, %v995_v45 }
 0x390   : > { %v1108_v25 = vpack.c.bf16 %v1096_v23, %v1095_v22 }
 0x391   : > { %v1060_v37 = vpop.permute.xlu1 %1059 }
 0x392   : > { %v1098_v27 = vmul.f32 %v1060_v37, %v998_v52  ;;  %1578 = vmatmul.mubr.msk.bf16.gmra.mrb[12].mxu0 %vm511_vm1, %v1108_v25  ;;  %v1062_v29 = vpop.permute.xlu0 %1061 }
 0x393   : > { %v1099_v19 = vmul.f32 %v1062_v29, %v1003_v53 }
 0x394   : > { %v1109_v31 = vpack.c.bf16 %v1098_v27, %v1097_v26 }
 0x395   : > { %v1064_v13 = vpop.permute.xlu1 %1063 }
 0x396   : > { %v1100_v32 = vmul.f32 %v1064_v13, %v1006_v34  ;;  %1581 = vmatprep.mubr.msk.bf16.mxu0 %vm511_vm1, %v1109_v31  ;;  %v1066_v35 = vpop.permute.xlu0 %1065  ;;  %v1466_v34 = vld [vmem:[%s2159_s8] ss:$0 sm:$0xff] }
 0x397   : > { %v1101_v42 = vmul.f32 %v1066_v35, %v1011_v61 }
 0x398   : > { %v1110_v38 = vpack.c.bf16 %v1100_v32, %v1099_v19 }
 0x399   : > { %v1068_v36 = vpop.permute.xlu1 %1067 }
 0x39a   : > { %v1102_v43 = vmul.f32 %v1068_v36, %v1014_v5  ;;  %1582 = vmatmul.mubr.msk.bf16.gmra.mrb[16].mxu0 %vm511_vm1, %v1110_v38  ;;  %v1070_v49 = vpop.permute.xlu0 %1069 }
 0x39b   : > { %v1103_v52 = vmul.f32 %v1070_v49, %v1019_v7 }
 0x39c   : > { %v1111_v45 = vpack.c.bf16 %v1102_v43, %v1101_v42 }
 0x39d   : > { %v1072_v50 = vpop.permute.xlu1 %1071 }
 0x39e   : > { %v1104_v28 = vmul.f32 %v1072_v50, %v1022_v8  ;;  %1585 = vmatprep.mubr.msk.bf16.mxu0 %vm511_vm1, %v1111_v45 }
 0x3a0   : > { %v1112_v57 = vpack.c.bf16 %v1104_v28, %v1103_v52 }
 0x3a2   : > { %1586 = vmatmul.mubr.msk.bf16.gmra.mrb[20].mxu0 %vm511_vm1, %v1112_v57 }
 0x45d   : > { %v1575_v53 = vpop.f32.mrb[8].mxu0 }
 0x45e   : > { %v1240_v61 = vadd.f32 %v1575_v53, %v1831_v62  ;;  %v1175_v63 = vpop.f32.mrb[9].mxu0 }
 0x45f   : > { %v1238_v0 = vadd.f32 %v1175_v63, %v1835_v2  ;;  %v1576_v5 = vpop.f32.mrb[10].mxu0 }
 0x460   : > { %v1263_v7 = vadd.f32 %v1466_v34, %v1240_v61  ;;  %v1241_v8 = vadd.f32 %v1576_v5, %v1839_v6  ;;  %v1178_v39 = vpop.f32.mrb[11].mxu0 }
 0x461   : > { %v1261_v46 = vadd.f32 %v1466_v34, %v1238_v0  ;;  %v1239_v62 = vadd.f32 %v1178_v39, %v1845_v11 }
 0x462   : > { %1279 = vst.msk [vmem:[%s2087_s16 + $0x10] sm:$0xff] %vm511_vm1, %v1263_v7  ;;  %v1264_v9 = vadd.f32 %v1466_v34, %v1241_v8 }
 0x463   : > { %1277 = vst.msk [vmem:[%s2087_s16] sm:$0xff] %vm511_vm1, %v1261_v46  ;;  %v1262_v12 = vadd.f32 %v1466_v34, %v1239_v62 }
 0x464   : > { %1280 = vst.msk [vmem:[%s2087_s16 + $0x18] sm:$0xff] %vm511_vm1, %v1264_v9 }
 0x465   : > { %1278 = vst.msk [vmem:[%s2087_s16 + $0x8] sm:$0xff] %vm511_vm1, %v1262_v12  ;;  %v1579_v2 = vpop.f32.mrb[12].mxu0 }
 0x466   : > { %v1244_v6 = vadd.f32 %v1579_v2, %v1865_v40  ;;  %v1191_v54 = vpop.f32.mrb[13].mxu0 }
 0x467   : > { %v1242_v11 = vadd.f32 %v1191_v54, %v1860_v33  ;;  %v1580_v15 = vpop.f32.mrb[14].mxu0 }
 0x468   : > { %v1267_v55 = vadd.f32 %v1466_v34, %v1244_v6  ;;  %v1245_v3 = vadd.f32 %v1580_v15, %v1873_v47  ;;  %v1194_v16 = vpop.f32.mrb[15].mxu0 }
 0x469   : > { %v1265_v18 = vadd.f32 %v1466_v34, %v1242_v11  ;;  %v1243_v21 = vadd.f32 %v1194_v16, %v1868_v41 }
 0x46a   : > { %1283 = vst.msk [vmem:[%s2087_s16 + $0x30] sm:$0xff] %vm511_vm1, %v1267_v55  ;;  %v1268_v10 = vadd.f32 %v1466_v34, %v1245_v3 }
 0x46b   : > { %1281 = vst.msk [vmem:[%s2087_s16 + $0x20] sm:$0xff] %vm511_vm1, %v1265_v18  ;;  %v1266_v14 = vadd.f32 %v1466_v34, %v1243_v21 }
 0x46c   : > { %1284 = vst.msk [vmem:[%s2087_s16 + $0x38] sm:$0xff] %vm511_vm1, %v1268_v10 }
 0x46d   : > { %1282 = vst.msk [vmem:[%s2087_s16 + $0x28] sm:$0xff] %vm511_vm1, %v1266_v14  ;;  %v1583_v33 = vpop.f32.mrb[16].mxu0 }
 0x46e   : > { %v1248_v40 = vadd.f32 %v1583_v33, %v1890_v56  ;;  %v1207_v47 = vpop.f32.mrb[17].mxu0 }
 0x46f   : > { %v1246_v41 = vadd.f32 %v1207_v47, %v1876_v48  ;;  %v1584_v17 = vpop.f32.mrb[18].mxu0 }
 0x470   : > { %v1271_v24 = vadd.f32 %v1466_v34, %v1248_v40  ;;  %v1249_v30 = vadd.f32 %v1584_v17, %v1895_v58  ;;  %v1210_v20 = vpop.f32.mrb[19].mxu0 }
 0x471   : > { %v1269_v22 = vadd.f32 %v1466_v34, %v1246_v41  ;;  %v1247_v23 = vadd.f32 %v1210_v20, %v1881_v51 }
 0x472   : > { %1287 = vst.msk [vmem:[%s2087_s16 + $0x50] sm:$0xff] %vm511_vm1, %v1271_v24  ;;  %v1272_v44 = vadd.f32 %v1466_v34, %v1249_v30 }
 0x473   : > { %1285 = vst.msk [vmem:[%s2087_s16 + $0x40] sm:$0xff] %vm511_vm1, %v1269_v22  ;;  %v1270_v25 = vadd.f32 %v1466_v34, %v1247_v23 }
 0x474   : > { %1288 = vst.msk [vmem:[%s2087_s16 + $0x58] sm:$0xff] %vm511_vm1, %v1272_v44 }
 0x475   : > { %1286 = vst.msk [vmem:[%s2087_s16 + $0x48] sm:$0xff] %vm511_vm1, %v1270_v25  ;;  %v1587_v48 = vpop.f32.mrb[20].mxu0 }
 0x476   : > { %v1252_v56 = vadd.f32 %v1587_v48, %v1910_v1  ;;  %v1223_v58 = vpop.f32.mrb[21].mxu0 }
 0x477   : > { %v1250_v51 = vadd.f32 %v1223_v58, %v1898_v59  ;;  %v1588_v37 = vpop.f32.mrb[22].mxu0 }
 0x478   : > { %v1275_v26 = vadd.f32 %v1466_v34, %v1252_v56  ;;  %v1253_v27 = vadd.f32 %v1588_v37, %v1915_v4  ;;  %v1226_v29 = vpop.f32.mrb[23].mxu0 }
 0x479   : > { %v1273_v31 = vadd.f32 %v1466_v34, %v1250_v51  ;;  %v1251_v13 = vadd.f32 %v1226_v29, %v1901_v60 }
 0x47a   : > { %1291 = vst.msk [vmem:[%s2087_s16 + $0x70] sm:$0xff] %vm511_vm1, %v1275_v26  ;;  %v1276_v19 = vadd.f32 %v1466_v34, %v1253_v27 }
 0x47b   : > { %1289 = vst.msk [vmem:[%s2087_s16 + $0x60] sm:$0xff] %vm511_vm1, %v1273_v31  ;;  %v1274_v32 = vadd.f32 %v1466_v34, %v1251_v13 }
 0x47c   : > { %1292 = vst.msk [vmem:[%s2087_s16 + $0x78] sm:$0xff] %vm511_vm1, %v1276_v19 }
 0x47d   : > { %1290 = vst.msk [vmem:[%s2087_s16 + $0x68] sm:$0xff] %vm511_vm1, %v1274_v32 }
 0x47e PF: > { %s19_s13 = sadd.s32 1, %s1706_s13   ;;  %s2161_s30 = smov %s1698_s11 }
 0x47f   : > { %p16_p7 = scmp.ge.s32.totalorder %s19_s13, 6   ;;  %s2162_s10 = smov %s1702_s12 }
 0x480   : > { %s2163_s11 = smov %s2166_s14  ;;  %s2164_s12 = smov %s2170_s15 }
 0x481   :  { %18 = sbr.rel (!%p16_p7) target bundleno = 3 (0x3), region = 92 }

</bundles_post_ra>
